<compile_context>
chip_gen: v5e
topology: v5e:2x2
jax: 0.10.0
libtpu: 0.0.40
codegen_flags: <defaults>
</compile_context>

<pallas_src>
import functools
import math

import jax
import jax.numpy as jnp
from jax.experimental import pallas as pl
from jax.experimental.pallas import tpu as pltpu


def _layer_norm(x, gamma, beta, eps=1e-5):
    mean = jnp.mean(x, axis=-1, keepdims=True)
    var = jnp.mean((x - mean) ** 2, axis=-1, keepdims=True)
    return (x - mean) * jax.lax.rsqrt(var + eps) * gamma + beta


def encoder_layer_kernel(n_head, d_k, d_v,
                         seq_ref, kpm_ref, npm_ref,
                         wq_ref, bq_ref, wk_ref, bk_ref, wv_ref, bv_ref,
                         wfc_ref, bfc_ref, g1_ref, be1_ref,
                         w1_ref, b1_ref, w2_ref, b2_ref, g2_ref, be2_ref,
                         o_ref):
    """One grid step == one batch element. Full MHA + FFN fused."""
    x = seq_ref[...]                       # (L, D) f32
    key_bias = kpm_ref[...]                # (1, L) f32: 0 for real keys, -1e30 for pad
    npm = npm_ref[...]                     # (L, 1) f32

    xb = x.astype(jnp.bfloat16)

    # Fused QKV projections: lane-dense (L, D) @ (D, n_head*d_k) matmuls.
    # Cast to bf16 once, right after the bias add.
    q = (jnp.dot(xb, wq_ref[...], preferred_element_type=jnp.float32)
         + bq_ref[...]).astype(jnp.bfloat16)            # (L, H*d_k)
    k = (jnp.dot(xb, wk_ref[...], preferred_element_type=jnp.float32)
         + bk_ref[...]).astype(jnp.bfloat16)            # (L, H*d_k)
    v = (jnp.dot(xb, wv_ref[...], preferred_element_type=jnp.float32)
         + bv_ref[...]).astype(jnp.bfloat16)            # (L, H*d_v)

    def split_heads(t, dh):  # (L, H*dh) -> (H, L, dh) via static lane slices
        return jnp.stack([t[:, h * dh:(h + 1) * dh] for h in range(n_head)],
                         axis=0)

    qh = split_heads(q, d_k)
    kh = split_heads(k, d_k)
    vh = split_heads(v, d_v)

    inv_temp = 1.0 / math.sqrt(d_k)
    scores = jnp.einsum('hqd,hkd->hqk', qh, kh,
                        preferred_element_type=jnp.float32) * inv_temp
    scores = scores + key_bias                           # additive large-negative mask
    scores = scores - jnp.max(scores, axis=-1, keepdims=True)
    p = jnp.exp(scores)
    # approx reciprocal (EUP slot): ~1e-3 rel error vs exact softmax, inside tol.
    p = p * pl.reciprocal(jnp.sum(p, axis=-1, keepdims=True), approx=True)

    ctx = jnp.einsum('hqk,hkd->hqd', p.astype(jnp.bfloat16), vh,
                     preferred_element_type=jnp.float32)  # (H, L, d_v)

    # concat heads -> single output projection with contraction dim n_head*d_v.
    ctx_cat = jnp.concatenate([ctx[h] for h in range(n_head)],
                              axis=-1).astype(jnp.bfloat16)       # (L, H*d_v)
    attn = jnp.dot(ctx_cat, wfc_ref[...],
                   preferred_element_type=jnp.float32) + bfc_ref[...]  # (L, D)

    # Residual + LayerNorm + non-pad mask (MHA sublayer).
    # Fully-padded rows produce garbage through LayerNorm but are zeroed by npm.
    attn = _layer_norm(attn + x, g1_ref[...], be1_ref[...]) * npm
    attn_b = attn.astype(jnp.bfloat16)

    # Position-wise FFN (Conv1d kernel-size-1 == linear).
    h1 = jnp.maximum(
        jnp.dot(attn_b, w1_ref[...], preferred_element_type=jnp.float32)
        + b1_ref[...], 0.0)
    h2 = jnp.dot(h1.astype(jnp.bfloat16), w2_ref[...],
                 preferred_element_type=jnp.float32) + b2_ref[...]
    out = _layer_norm(h2 + attn, g2_ref[...], be2_ref[...]) * npm

    o_ref[...] = out.astype(o_ref.dtype)


def _const_spec(arr, pipeline_mode=None):
    idx = lambda b, _nd=arr.ndim: (0,) * _nd
    if pipeline_mode is None:
        return pl.BlockSpec(arr.shape, idx)
    return pl.BlockSpec(arr.shape, idx, pipeline_mode=pipeline_mode)


def _vmem_limit_bytes(L, D, n_head, d_k, d_v, d_inner, weights):
    """Budget from the actual in-kernel live set, capped by device capacity."""
    f32, bf16 = 4, 2
    weight_bytes = sum(int(w.size) * w.dtype.itemsize for w in weights)
    blocks = 2 * 2 * L * D * f32 + 2 * 2 * L * f32       # seq/out + masks, 2x buffered
    inter = (3 * L * n_head * d_k * (f32 + bf16)          # q, k, v (+ bf16 copies)
             + n_head * L * L * (f32 + bf16)              # scores f32 + p bf16
             + n_head * L * d_v * (f32 + bf16)            # ctx (+ concat copy)
             + L * d_inner * (f32 + bf16)                 # h1
             + 4 * L * D * f32)                           # attn / h2 / out / misc
    need = int((2 * weight_bytes + blocks + inter) * 1.5)  # Mosaic scratch headroom
    try:
        cap = int(pltpu.get_tpu_info().vmem_capacity_bytes)
    except Exception:
        cap = 64 * 1024 * 1024                            # conservative fallback
    ceiling = max(cap - 12 * 1024 * 1024, 16 * 1024 * 1024)
    return int(min(max(need, 16 * 1024 * 1024), ceiling))


def run_encoder_layer(seq, kpm_bias, npm, params, n_head, d_k, d_v):
    B, L, D = seq.shape
    weights = tuple(params)   # (wq, bq, wk, bk, wv, bv, wfc, bfc, g1, be1,
                              #  w1, b1, w2, b2, g2, be2) -- fused layouts, no reshaping
    d_inner = weights[10].shape[1]

    kernel = functools.partial(encoder_layer_kernel, n_head, d_k, d_v)
    out_shape = jax.ShapeDtypeStruct((B, L, D), jnp.float32)
    vmem_limit = _vmem_limit_bytes(L, D, n_head, d_k, d_v, d_inner, weights)

    def build(weight_mode):
        in_specs = [
            pl.BlockSpec((None, L, D), lambda b: (b, 0, 0)),   # seq  -> (L, D)
            pl.BlockSpec((None, 1, L), lambda b: (b, 0, 0)),   # key-pad bias -> (1, L)
            pl.BlockSpec((None, L, 1), lambda b: (b, 0, 0)),   # non-pad mask -> (L, 1)
        ] + [_const_spec(p, weight_mode) for p in weights]
        return pl.pallas_call(
            kernel,
            out_shape=out_shape,
            grid_spec=pltpu.PrefetchScalarGridSpec(
                num_scalar_prefetch=0,
                grid=(B,),
                in_specs=in_specs,
                out_specs=pl.BlockSpec((None, L, D), lambda b: (b, 0, 0)),
            ),
            compiler_params=pltpu.CompilerParams(
                dimension_semantics=("parallel",),
                vmem_limit_bytes=vmem_limit,
            ),
        )

    # Weight blocks have a constant index_map -> single-buffer them when the
    # installed Pallas supports pipeline_mode; otherwise fall back cleanly.
    try:
        if hasattr(pl, "Buffered"):
            return build(pl.Buffered(1))(seq, kpm_bias, npm, *weights)
    except Exception:
        pass
    return build(None)(seq, kpm_bias, npm, *weights)


def encoder_forward(seq, mask, layer_params, n_head, d_k, d_v):
    """Matches Encoder.forward(seq, mask): every layer consumes the ORIGINAL
    `seq` and only the last layer's enc_output is returned, so in eval mode
    only the last layer needs to run."""
    kpm_bias = jnp.where(mask == 0, jnp.float32(-1e30),
                         jnp.float32(0.0))[:, None, :]                 # (B, 1, L)
    npm = (mask != 0).astype(jnp.float32)[:, :, None]                  # (B, L, 1)
    return run_encoder_layer(seq, kpm_bias, npm, layer_params[-1],
                             n_head, d_k, d_v)


# ---------------- pure-JAX reference for verification ----------------
def reference_forward(seq, mask, layer_params, n_head, d_k, d_v):
    B, L, D = seq.shape
    key_bias = jnp.where(mask == 0, jnp.float32(-1e30),
                         jnp.float32(0.0))[:, None, None, :]           # (B,1,1,L)
    npm = (mask != 0).astype(jnp.float32)[:, :, None]                  # (B,L,1)
    out = None
    for (wq, bq, wk, bk, wv, bv, wfc, bfc, g1, be1,
         w1, b1, w2, b2, g2, be2) in layer_params:
        x = seq
        xb = x.astype(jnp.bfloat16)
        q = (jnp.dot(xb, wq, preferred_element_type=jnp.float32) + bq
             ).reshape(B, L, n_head, d_k).transpose(0, 2, 1, 3)
        k = (jnp.dot(xb, wk, preferred_element_type=jnp.float32) + bk
             ).reshape(B, L, n_head, d_k).transpose(0, 2, 1, 3)
        v = (jnp.dot(xb, wv, preferred_element_type=jnp.float32) + bv
             ).reshape(B, L, n_head, d_v).transpose(0, 2, 1, 3)
        scores = jnp.einsum('bhqd,bhkd->bhqk', q.astype(jnp.bfloat16),
                            k.astype(jnp.bfloat16),
                            preferred_element_type=jnp.float32) / math.sqrt(d_k)
        scores = scores + key_bias
        p = jax.nn.softmax(scores, axis=-1)
        ctx = jnp.einsum('bhqk,bhkd->bhqd', p.astype(jnp.bfloat16),
                         v.astype(jnp.bfloat16),
                         preferred_element_type=jnp.float32)
        ctx = ctx.transpose(0, 2, 1, 3).reshape(B, L, n_head * d_v)
        attn = jnp.dot(ctx.astype(jnp.bfloat16), wfc,
                       preferred_element_type=jnp.float32) + bfc
        attn = _layer_norm(attn + x, g1, be1) * npm
        h1 = jax.nn.relu(jnp.dot(attn.astype(jnp.bfloat16), w1,
                                 preferred_element_type=jnp.float32) + b1)
        h2 = jnp.dot(h1.astype(jnp.bfloat16), w2,
                     preferred_element_type=jnp.float32) + b2
        out = _layer_norm(h2 + attn, g2, be2) * npm
    return out


def init_encoder_params(key, n_layers, n_head, d_k, d_v, d_model, d_inner):
    def nrm_bf16(k, shape, scale):
        return (jax.random.normal(k, shape, jnp.float32) * scale).astype(jnp.bfloat16)

    layers = []
    for _ in range(n_layers):
        key, *ks = jax.random.split(key, 13)
        wq = nrm_bf16(ks[0], (d_model, n_head * d_k), math.sqrt(2.0 / (d_model + d_k)))
        wk = nrm_bf16(ks[1], (d_model, n_head * d_k), math.sqrt(2.0 / (d_model + d_k)))
        wv = nrm_bf16(ks[2], (d_model, n_head * d_v), math.sqrt(2.0 / (d_model + d_v)))
        bq = jax.random.normal(ks[3], (1, n_head * d_k), jnp.float32) * 0.02
        bk = jax.random.normal(ks[4], (1, n_head * d_k), jnp.float32) * 0.02
        bv = jax.random.normal(ks[5], (1, n_head * d_v), jnp.float32) * 0.02
        wfc = nrm_bf16(ks[6], (n_head * d_v, d_model), 1.0 / math.sqrt(n_head * d_v))
        bfc = jax.random.normal(ks[7], (1, d_model), jnp.float32) * 0.02
        g1 = jnp.ones((1, d_model), jnp.float32)
        be1 = jnp.zeros((1, d_model), jnp.float32)
        w1 = nrm_bf16(ks[8], (d_model, d_inner), 1.0 / math.sqrt(d_model))
        b1 = jax.random.normal(ks[9], (1, d_inner), jnp.float32) * 0.02
        w2 = nrm_bf16(ks[10], (d_inner, d_model), 1.0 / math.sqrt(d_inner))
        b2 = jax.random.normal(ks[11], (1, d_model), jnp.float32) * 0.02
        g2 = jnp.ones((1, d_model), jnp.float32)
        be2 = jnp.zeros((1, d_model), jnp.float32)
        layers.append((wq, bq, wk, bk, wv, bv, wfc, bfc, g1, be1,
                       w1, b1, w2, b2, g2, be2))
    return layers


if __name__ == "__main__":
    B, L = 2, 8
    n_layers, n_head, d_k, d_v, d_model, d_inner = 2, 2, 16, 16, 32, 64

    key = jax.random.PRNGKey(0)
    k_seq, k_par = jax.random.split(key)
    seq = jax.random.normal(k_seq, (B, L, d_model), jnp.float32)
    mask = jnp.ones((B, L), jnp.float32).at[1, 6:].set(0.0)   # batch 1 has padding

    params = init_encoder_params(k_par, n_layers, n_head, d_k, d_v, d_model, d_inner)

    out = jax.block_until_ready(encoder_forward(seq, mask, params, n_head, d_k, d_v))
    ref = jax.block_until_ready(reference_forward(seq, mask, params, n_head, d_k, d_v))

    assert out.shape == (B, L, d_model)
    max_err = float(jnp.max(jnp.abs(out - ref)))
    assert jnp.allclose(out, ref, rtol=2e-2, atol=2e-2), max_err

    print("KERNEL_OK")
</pallas_src>

<mosaic_0001>
module attributes {stable_mosaic.version = 11 : i64} {
  func.func @encoder_layer_kernel(%arg0: i32, %arg1: memref<1x8x32xf32, #tpu.memory_space<vmem>>, %arg2: memref<1x1x8xf32, #tpu.memory_space<vmem>>, %arg3: memref<1x8x1xf32, #tpu.memory_space<vmem>>, %arg4: memref<32x32xbf16, #tpu.memory_space<vmem>>, %arg5: memref<1x32xf32, #tpu.memory_space<vmem>>, %arg6: memref<32x32xbf16, #tpu.memory_space<vmem>>, %arg7: memref<1x32xf32, #tpu.memory_space<vmem>>, %arg8: memref<32x32xbf16, #tpu.memory_space<vmem>>, %arg9: memref<1x32xf32, #tpu.memory_space<vmem>>, %arg10: memref<32x32xbf16, #tpu.memory_space<vmem>>, %arg11: memref<1x32xf32, #tpu.memory_space<vmem>>, %arg12: memref<1x32xf32, #tpu.memory_space<vmem>>, %arg13: memref<1x32xf32, #tpu.memory_space<vmem>>, %arg14: memref<32x64xbf16, #tpu.memory_space<vmem>>, %arg15: memref<1x64xf32, #tpu.memory_space<vmem>>, %arg16: memref<64x32xbf16, #tpu.memory_space<vmem>>, %arg17: memref<1x32xf32, #tpu.memory_space<vmem>>, %arg18: memref<1x32xf32, #tpu.memory_space<vmem>>, %arg19: memref<1x32xf32, #tpu.memory_space<vmem>>, %arg20: memref<1x8x32xf32, #tpu.memory_space<vmem>>) attributes {dimension_semantics = [#tpu.dimension_semantics<parallel>], iteration_bounds = array<i64: 2>, scalar_prefetch = 0 : i64, scratch_operands = 0 : i64, tpu.core_type = #tpu.core_type<tc>, window_params = [{transform_indices = @transform_0, window_bounds = array<i64: 1, 8, 32>}, {transform_indices = @transform_1, window_bounds = array<i64: 1, 1, 8>}, {transform_indices = @transform_2, window_bounds = array<i64: 1, 8, 1>}, {pipeline_mode = #tpu.pipeline_mode<synchronous>, transform_indices = @transform_3, window_bounds = array<i64: 32, 32>}, {pipeline_mode = #tpu.pipeline_mode<synchronous>, transform_indices = @transform_4, window_bounds = array<i64: 1, 32>}, {pipeline_mode = #tpu.pipeline_mode<synchronous>, transform_indices = @transform_5, window_bounds = array<i64: 32, 32>}, {pipeline_mode = #tpu.pipeline_mode<synchronous>, transform_indices = @transform_6, window_bounds = array<i64: 1, 32>}, {pipeline_mode = #tpu.pipeline_mode<synchronous>, transform_indices = @transform_7, window_bounds = array<i64: 32, 32>}, {pipeline_mode = #tpu.pipeline_mode<synchronous>, transform_indices = @transform_8, window_bounds = array<i64: 1, 32>}, {pipeline_mode = #tpu.pipeline_mode<synchronous>, transform_indices = @transform_9, window_bounds = array<i64: 32, 32>}, {pipeline_mode = #tpu.pipeline_mode<synchronous>, transform_indices = @transform_10, window_bounds = array<i64: 1, 32>}, {pipeline_mode = #tpu.pipeline_mode<synchronous>, transform_indices = @transform_11, window_bounds = array<i64: 1, 32>}, {pipeline_mode = #tpu.pipeline_mode<synchronous>, transform_indices = @transform_12, window_bounds = array<i64: 1, 32>}, {pipeline_mode = #tpu.pipeline_mode<synchronous>, transform_indices = @transform_13, window_bounds = array<i64: 32, 64>}, {pipeline_mode = #tpu.pipeline_mode<synchronous>, transform_indices = @transform_14, window_bounds = array<i64: 1, 64>}, {pipeline_mode = #tpu.pipeline_mode<synchronous>, transform_indices = @transform_15, window_bounds = array<i64: 64, 32>}, {pipeline_mode = #tpu.pipeline_mode<synchronous>, transform_indices = @transform_16, window_bounds = array<i64: 1, 32>}, {pipeline_mode = #tpu.pipeline_mode<synchronous>, transform_indices = @transform_17, window_bounds = array<i64: 1, 32>}, {pipeline_mode = #tpu.pipeline_mode<synchronous>, transform_indices = @transform_18, window_bounds = array<i64: 1, 32>}, {transform_indices = @transform_19, window_bounds = array<i64: 1, 8, 32>}]} {
    %c0 = arith.constant 0 : index
    %c0_0 = arith.constant 0 : index
    %c0_1 = arith.constant 0 : index
    %0 = vector.load %arg1[%c0, %c0_0, %c0_1] : memref<1x8x32xf32, #tpu.memory_space<vmem>>, vector<1x8x32xf32>
    %1 = vector.shape_cast %0 : vector<1x8x32xf32> to vector<8x32xf32>
    %c0_2 = arith.constant 0 : index
    %c0_3 = arith.constant 0 : index
    %c0_4 = arith.constant 0 : index
    %2 = vector.load %arg2[%c0_2, %c0_3, %c0_4] : memref<1x1x8xf32, #tpu.memory_space<vmem>>, vector<1x1x8xf32>
    %3 = vector.shape_cast %2 : vector<1x1x8xf32> to vector<1x8xf32>
    %c0_5 = arith.constant 0 : index
    %c0_6 = arith.constant 0 : index
    %c0_7 = arith.constant 0 : index
    %4 = vector.load %arg3[%c0_5, %c0_6, %c0_7] : memref<1x8x1xf32, #tpu.memory_space<vmem>>, vector<1x8x1xf32>
    %5 = vector.shape_cast %4 : vector<1x8x1xf32> to vector<8x1xf32>
    %6 = arith.truncf %1 : vector<8x32xf32> to vector<8x32xbf16>
    %c0_8 = arith.constant 0 : index
    %c0_9 = arith.constant 0 : index
    %7 = vector.load %arg4[%c0_8, %c0_9] : memref<32x32xbf16, #tpu.memory_space<vmem>>, vector<32x32xbf16>
    %cst = arith.constant dense<0.000000e+00> : vector<8x32xf32>
    %8 = tpu.matmul %6, %7, %cst {dimension_numbers = #tpu.dot_dimension_numbers<[1], [0], [0], [1], [0, 0, 1, 1], [], []>} : vector<8x32xbf16>, vector<32x32xbf16>, vector<8x32xf32> -> vector<8x32xf32>
    %c0_10 = arith.constant 0 : index
    %c0_11 = arith.constant 0 : index
    %9 = vector.load %arg5[%c0_10, %c0_11] : memref<1x32xf32, #tpu.memory_space<vmem>>, vector<1x32xf32>
    %10 = vector.broadcast %9 : vector<1x32xf32> to vector<8x32xf32>
    %11 = arith.addf %8, %10 : vector<8x32xf32>
    %12 = arith.truncf %11 : vector<8x32xf32> to vector<8x32xbf16>
    %c0_12 = arith.constant 0 : index
    %c0_13 = arith.constant 0 : index
    %13 = vector.load %arg6[%c0_12, %c0_13] : memref<32x32xbf16, #tpu.memory_space<vmem>>, vector<32x32xbf16>
    %cst_14 = arith.constant dense<0.000000e+00> : vector<8x32xf32>
    %14 = tpu.matmul %6, %13, %cst_14 {dimension_numbers = #tpu.dot_dimension_numbers<[1], [0], [0], [1], [0, 0, 1, 1], [], []>} : vector<8x32xbf16>, vector<32x32xbf16>, vector<8x32xf32> -> vector<8x32xf32>
    %c0_15 = arith.constant 0 : index
    %c0_16 = arith.constant 0 : index
    %15 = vector.load %arg7[%c0_15, %c0_16] : memref<1x32xf32, #tpu.memory_space<vmem>>, vector<1x32xf32>
    %16 = vector.broadcast %15 : vector<1x32xf32> to vector<8x32xf32>
    %17 = arith.addf %14, %16 : vector<8x32xf32>
    %18 = arith.truncf %17 : vector<8x32xf32> to vector<8x32xbf16>
    %c0_17 = arith.constant 0 : index
    %c0_18 = arith.constant 0 : index
    %19 = vector.load %arg8[%c0_17, %c0_18] : memref<32x32xbf16, #tpu.memory_space<vmem>>, vector<32x32xbf16>
    %cst_19 = arith.constant dense<0.000000e+00> : vector<8x32xf32>
    %20 = tpu.matmul %6, %19, %cst_19 {dimension_numbers = #tpu.dot_dimension_numbers<[1], [0], [0], [1], [0, 0, 1, 1], [], []>} : vector<8x32xbf16>, vector<32x32xbf16>, vector<8x32xf32> -> vector<8x32xf32>
    %c0_20 = arith.constant 0 : index
    %c0_21 = arith.constant 0 : index
    %21 = vector.load %arg9[%c0_20, %c0_21] : memref<1x32xf32, #tpu.memory_space<vmem>>, vector<1x32xf32>
    %22 = vector.broadcast %21 : vector<1x32xf32> to vector<8x32xf32>
    %23 = arith.addf %20, %22 : vector<8x32xf32>
    %24 = arith.truncf %23 : vector<8x32xf32> to vector<8x32xbf16>
    %25 = vector.extract_strided_slice %12 {offsets = [0, 0], sizes = [8, 16], strides = [1, 1]} : vector<8x32xbf16> to vector<8x16xbf16>
    %26 = vector.extract_strided_slice %12 {offsets = [0, 16], sizes = [8, 16], strides = [1, 1]} : vector<8x32xbf16> to vector<8x16xbf16>
    %27 = vector.shape_cast %25 : vector<8x16xbf16> to vector<1x8x16xbf16>
    %28 = vector.shape_cast %26 : vector<8x16xbf16> to vector<1x8x16xbf16>
    %29 = tpu.concatenate %27, %28 in 0 : vector<1x8x16xbf16>, vector<1x8x16xbf16> -> vector<2x8x16xbf16>
    %30 = vector.extract_strided_slice %18 {offsets = [0, 0], sizes = [8, 16], strides = [1, 1]} : vector<8x32xbf16> to vector<8x16xbf16>
    %31 = vector.extract_strided_slice %18 {offsets = [0, 16], sizes = [8, 16], strides = [1, 1]} : vector<8x32xbf16> to vector<8x16xbf16>
    %32 = vector.shape_cast %30 : vector<8x16xbf16> to vector<1x8x16xbf16>
    %33 = vector.shape_cast %31 : vector<8x16xbf16> to vector<1x8x16xbf16>
    %34 = tpu.concatenate %32, %33 in 0 : vector<1x8x16xbf16>, vector<1x8x16xbf16> -> vector<2x8x16xbf16>
    %35 = vector.extract_strided_slice %24 {offsets = [0, 0], sizes = [8, 16], strides = [1, 1]} : vector<8x32xbf16> to vector<8x16xbf16>
    %36 = vector.extract_strided_slice %24 {offsets = [0, 16], sizes = [8, 16], strides = [1, 1]} : vector<8x32xbf16> to vector<8x16xbf16>
    %37 = vector.shape_cast %35 : vector<8x16xbf16> to vector<1x8x16xbf16>
    %38 = vector.shape_cast %36 : vector<8x16xbf16> to vector<1x8x16xbf16>
    %39 = tpu.concatenate %37, %38 in 0 : vector<1x8x16xbf16>, vector<1x8x16xbf16> -> vector<2x8x16xbf16>
    "tpu.trace_start"() <{level = 10 : i32, message = "hqd,hkd->hqk"}> : () -> ()
    %cst_22 = arith.constant dense<0.000000e+00> : vector<2x8x8xf32>
    %40 = tpu.matmul %29, %34, %cst_22 {dimension_numbers = #tpu.dot_dimension_numbers<[2], [2], [1], [1], [0, 0, 0, 1, 1, 1], [0], [0]>} : vector<2x8x16xbf16>, vector<2x8x16xbf16>, vector<2x8x8xf32> -> vector<2x8x8xf32>
    "tpu.trace_stop"() : () -> ()
    %cst_23 = arith.constant 2.500000e-01 : f32
    %41 = vector.broadcast %cst_23 : f32 to vector<2x8x8xf32>
    %42 = arith.mulf %40, %41 : vector<2x8x8xf32>
    %43 = vector.shape_cast %3 : vector<1x8xf32> to vector<1x1x8xf32>
    %44 = vector.broadcast %43 : vector<1x1x8xf32> to vector<2x8x8xf32>
    %45 = arith.addf %42, %44 : vector<2x8x8xf32>
    %cst_24 = arith.constant dense<0xFF800000> : vector<2x8xf32>
    %46 = vector.multi_reduction <maximumf>, %45, %cst_24 [2] : vector<2x8x8xf32> to vector<2x8xf32>
    %47 = vector.shape_cast %46 : vector<2x8xf32> to vector<2x8x1xf32>
    %48 = vector.broadcast %47 : vector<2x8x1xf32> to vector<2x8x8xf32>
    %49 = arith.subf %45, %48 : vector<2x8x8xf32>
    %50 = math.exp %49 : vector<2x8x8xf32>
    %cst_25 = arith.constant dense<0.000000e+00> : vector<2x8xf32>
    %51 = vector.multi_reduction <add>, %50, %cst_25 [2] : vector<2x8x8xf32> to vector<2x8xf32>
    %52 = vector.shape_cast %51 : vector<2x8xf32> to vector<2x8x1xf32>
    %53 = tpu.reciprocal %52 {approx = true} : vector<2x8x1xf32> -> vector<2x8x1xf32>
    %54 = vector.broadcast %53 : vector<2x8x1xf32> to vector<2x8x8xf32>
    %55 = arith.mulf %50, %54 : vector<2x8x8xf32>
    %56 = arith.truncf %55 : vector<2x8x8xf32> to vector<2x8x8xbf16>
    "tpu.trace_start"() <{level = 10 : i32, message = "hqk,hkd->hqd"}> : () -> ()
    %cst_26 = arith.constant dense<0.000000e+00> : vector<2x8x16xf32>
    %57 = tpu.matmul %56, %39, %cst_26 {dimension_numbers = #tpu.dot_dimension_numbers<[2], [1], [1], [2], [0, 0, 0, 1, 1, 2], [0], [0]>} : vector<2x8x8xbf16>, vector<2x8x16xbf16>, vector<2x8x16xf32> -> vector<2x8x16xf32>
    "tpu.trace_stop"() : () -> ()
    %58 = vector.extract_strided_slice %57 {offsets = [0, 0, 0], sizes = [1, 8, 16], strides = [1, 1, 1]} : vector<2x8x16xf32> to vector<1x8x16xf32>
    %59 = vector.shape_cast %58 : vector<1x8x16xf32> to vector<8x16xf32>
    %60 = vector.extract_strided_slice %57 {offsets = [1, 0, 0], sizes = [1, 8, 16], strides = [1, 1, 1]} : vector<2x8x16xf32> to vector<1x8x16xf32>
    %61 = vector.shape_cast %60 : vector<1x8x16xf32> to vector<8x16xf32>
    %62 = tpu.concatenate %59, %61 in 1 : vector<8x16xf32>, vector<8x16xf32> -> vector<8x32xf32>
    %63 = arith.truncf %62 : vector<8x32xf32> to vector<8x32xbf16>
    %c0_27 = arith.constant 0 : index
    %c0_28 = arith.constant 0 : index
    %64 = vector.load %arg10[%c0_27, %c0_28] : memref<32x32xbf16, #tpu.memory_space<vmem>>, vector<32x32xbf16>
    %cst_29 = arith.constant dense<0.000000e+00> : vector<8x32xf32>
    %65 = tpu.matmul %63, %64, %cst_29 {dimension_numbers = #tpu.dot_dimension_numbers<[1], [0], [0], [1], [0, 0, 1, 1], [], []>} : vector<8x32xbf16>, vector<32x32xbf16>, vector<8x32xf32> -> vector<8x32xf32>
    %c0_30 = arith.constant 0 : index
    %c0_31 = arith.constant 0 : index
    %66 = vector.load %arg11[%c0_30, %c0_31] : memref<1x32xf32, #tpu.memory_space<vmem>>, vector<1x32xf32>
    %67 = vector.broadcast %66 : vector<1x32xf32> to vector<8x32xf32>
    %68 = arith.addf %65, %67 : vector<8x32xf32>
    %69 = arith.addf %68, %1 : vector<8x32xf32>
    %c0_32 = arith.constant 0 : index
    %c0_33 = arith.constant 0 : index
    %70 = vector.load %arg12[%c0_32, %c0_33] : memref<1x32xf32, #tpu.memory_space<vmem>>, vector<1x32xf32>
    %c0_34 = arith.constant 0 : index
    %c0_35 = arith.constant 0 : index
    %71 = vector.load %arg13[%c0_34, %c0_35] : memref<1x32xf32, #tpu.memory_space<vmem>>, vector<1x32xf32>
    %cst_36 = arith.constant dense<0.000000e+00> : vector<8xf32>
    %72 = vector.multi_reduction <add>, %69, %cst_36 [1] : vector<8x32xf32> to vector<8xf32>
    %73 = vector.shape_cast %72 : vector<8xf32> to vector<8x1xf32>
    %cst_37 = arith.constant 3.200000e+01 : f32
    %74 = vector.broadcast %cst_37 : f32 to vector<8x1xf32>
    %75 = arith.divf %73, %74 : vector<8x1xf32>
    %76 = vector.broadcast %75 : vector<8x1xf32> to vector<8x32xf32>
    %77 = arith.subf %69, %76 : vector<8x32xf32>
    %78 = arith.mulf %77, %77 : vector<8x32xf32>
    %cst_38 = arith.constant dense<0.000000e+00> : vector<8xf32>
    %79 = vector.multi_reduction <add>, %78, %cst_38 [1] : vector<8x32xf32> to vector<8xf32>
    %80 = vector.shape_cast %79 : vector<8xf32> to vector<8x1xf32>
    %cst_39 = arith.constant 3.200000e+01 : f32
    %81 = vector.broadcast %cst_39 : f32 to vector<8x1xf32>
    %82 = arith.divf %80, %81 : vector<8x1xf32>
    %83 = vector.broadcast %75 : vector<8x1xf32> to vector<8x32xf32>
    %84 = arith.subf %69, %83 : vector<8x32xf32>
    %cst_40 = arith.constant 9.99999974E-6 : f32
    %85 = vector.broadcast %cst_40 : f32 to vector<8x1xf32>
    %86 = arith.addf %82, %85 : vector<8x1xf32>
    %87 = math.rsqrt %86 : vector<8x1xf32>
    %88 = vector.broadcast %87 : vector<8x1xf32> to vector<8x32xf32>
    %89 = arith.mulf %84, %88 : vector<8x32xf32>
    %90 = vector.broadcast %70 : vector<1x32xf32> to vector<8x32xf32>
    %91 = arith.mulf %89, %90 : vector<8x32xf32>
    %92 = vector.broadcast %71 : vector<1x32xf32> to vector<8x32xf32>
    %93 = arith.addf %91, %92 : vector<8x32xf32>
    %94 = vector.broadcast %5 : vector<8x1xf32> to vector<8x32xf32>
    %95 = arith.mulf %93, %94 : vector<8x32xf32>
    %96 = arith.truncf %95 : vector<8x32xf32> to vector<8x32xbf16>
    %c0_41 = arith.constant 0 : index
    %c0_42 = arith.constant 0 : index
    %97 = vector.load %arg14[%c0_41, %c0_42] : memref<32x64xbf16, #tpu.memory_space<vmem>>, vector<32x64xbf16>
    %cst_43 = arith.constant dense<0.000000e+00> : vector<8x64xf32>
    %98 = tpu.matmul %96, %97, %cst_43 {dimension_numbers = #tpu.dot_dimension_numbers<[1], [0], [0], [1], [0, 0, 1, 1], [], []>} : vector<8x32xbf16>, vector<32x64xbf16>, vector<8x64xf32> -> vector<8x64xf32>
    %c0_44 = arith.constant 0 : index
    %c0_45 = arith.constant 0 : index
    %99 = vector.load %arg15[%c0_44, %c0_45] : memref<1x64xf32, #tpu.memory_space<vmem>>, vector<1x64xf32>
    %100 = vector.broadcast %99 : vector<1x64xf32> to vector<8x64xf32>
    %101 = arith.addf %98, %100 : vector<8x64xf32>
    %cst_46 = arith.constant 0.000000e+00 : f32
    %102 = vector.broadcast %cst_46 : f32 to vector<8x64xf32>
    %103 = arith.maximumf %101, %102 : vector<8x64xf32>
    %104 = arith.truncf %103 : vector<8x64xf32> to vector<8x64xbf16>
    %c0_47 = arith.constant 0 : index
    %c0_48 = arith.constant 0 : index
    %105 = vector.load %arg16[%c0_47, %c0_48] : memref<64x32xbf16, #tpu.memory_space<vmem>>, vector<64x32xbf16>
    %cst_49 = arith.constant dense<0.000000e+00> : vector<8x32xf32>
    %106 = tpu.matmul %104, %105, %cst_49 {dimension_numbers = #tpu.dot_dimension_numbers<[1], [0], [0], [1], [0, 0, 1, 1], [], []>} : vector<8x64xbf16>, vector<64x32xbf16>, vector<8x32xf32> -> vector<8x32xf32>
    %c0_50 = arith.constant 0 : index
    %c0_51 = arith.constant 0 : index
    %107 = vector.load %arg17[%c0_50, %c0_51] : memref<1x32xf32, #tpu.memory_space<vmem>>, vector<1x32xf32>
    %108 = vector.broadcast %107 : vector<1x32xf32> to vector<8x32xf32>
    %109 = arith.addf %106, %108 : vector<8x32xf32>
    %110 = arith.addf %109, %95 : vector<8x32xf32>
    %c0_52 = arith.constant 0 : index
    %c0_53 = arith.constant 0 : index
    %111 = vector.load %arg18[%c0_52, %c0_53] : memref<1x32xf32, #tpu.memory_space<vmem>>, vector<1x32xf32>
    %c0_54 = arith.constant 0 : index
    %c0_55 = arith.constant 0 : index
    %112 = vector.load %arg19[%c0_54, %c0_55] : memref<1x32xf32, #tpu.memory_space<vmem>>, vector<1x32xf32>
    %cst_56 = arith.constant dense<0.000000e+00> : vector<8xf32>
    %113 = vector.multi_reduction <add>, %110, %cst_56 [1] : vector<8x32xf32> to vector<8xf32>
    %114 = vector.shape_cast %113 : vector<8xf32> to vector<8x1xf32>
    %cst_57 = arith.constant 3.200000e+01 : f32
    %115 = vector.broadcast %cst_57 : f32 to vector<8x1xf32>
    %116 = arith.divf %114, %115 : vector<8x1xf32>
    %117 = vector.broadcast %116 : vector<8x1xf32> to vector<8x32xf32>
    %118 = arith.subf %110, %117 : vector<8x32xf32>
    %119 = arith.mulf %118, %118 : vector<8x32xf32>
    %cst_58 = arith.constant dense<0.000000e+00> : vector<8xf32>
    %120 = vector.multi_reduction <add>, %119, %cst_58 [1] : vector<8x32xf32> to vector<8xf32>
    %121 = vector.shape_cast %120 : vector<8xf32> to vector<8x1xf32>
    %cst_59 = arith.constant 3.200000e+01 : f32
    %122 = vector.broadcast %cst_59 : f32 to vector<8x1xf32>
    %123 = arith.divf %121, %122 : vector<8x1xf32>
    %124 = vector.broadcast %116 : vector<8x1xf32> to vector<8x32xf32>
    %125 = arith.subf %110, %124 : vector<8x32xf32>
    %cst_60 = arith.constant 9.99999974E-6 : f32
    %126 = vector.broadcast %cst_60 : f32 to vector<8x1xf32>
    %127 = arith.addf %123, %126 : vector<8x1xf32>
    %128 = math.rsqrt %127 : vector<8x1xf32>
    %129 = vector.broadcast %128 : vector<8x1xf32> to vector<8x32xf32>
    %130 = arith.mulf %125, %129 : vector<8x32xf32>
    %131 = vector.broadcast %111 : vector<1x32xf32> to vector<8x32xf32>
    %132 = arith.mulf %130, %131 : vector<8x32xf32>
    %133 = vector.broadcast %112 : vector<1x32xf32> to vector<8x32xf32>
    %134 = arith.addf %132, %133 : vector<8x32xf32>
    %135 = vector.broadcast %5 : vector<8x1xf32> to vector<8x32xf32>
    %136 = arith.mulf %134, %135 : vector<8x32xf32>
    %c0_61 = arith.constant 0 : index
    %c0_62 = arith.constant 0 : index
    %c0_63 = arith.constant 0 : index
    %137 = vector.load %arg20[%c0_61, %c0_62, %c0_63] : memref<1x8x32xf32, #tpu.memory_space<vmem>>, vector<1x8x32xf32>
    %138 = vector.shape_cast %137 : vector<1x8x32xf32> to vector<8x32xf32>
    %139 = vector.shape_cast %136 : vector<8x32xf32> to vector<1x8x32xf32>
    tpu.vector_store %arg20[%c0_61, %c0_62, %c0_63], %139 {strides = array<i32>} : memref<1x8x32xf32, #tpu.memory_space<vmem>>, vector<1x8x32xf32>,
    return
  }
  func.func @transform_0(%arg0: i32) -> (i32, i32, i32) {
    %c0_i32 = arith.constant 0 : i32
    %c0_i32_0 = arith.constant 0 : i32
    %c0_i32_1 = arith.constant 0 : i32
    return %arg0, %c0_i32, %c0_i32_0 : i32, i32, i32
  }
  func.func @transform_1(%arg0: i32) -> (i32, i32, i32) {
    %c0_i32 = arith.constant 0 : i32
    %c0_i32_0 = arith.constant 0 : i32
    %c0_i32_1 = arith.constant 0 : i32
    return %arg0, %c0_i32, %c0_i32_0 : i32, i32, i32
  }
  func.func @transform_2(%arg0: i32) -> (i32, i32, i32) {
    %c0_i32 = arith.constant 0 : i32
    %c0_i32_0 = arith.constant 0 : i32
    %c0_i32_1 = arith.constant 0 : i32
    return %arg0, %c0_i32, %c0_i32_0 : i32, i32, i32
  }
  func.func @transform_3(%arg0: i32) -> (i32, i32) {
    %c0_i32 = arith.constant 0 : i32
    %c0_i32_0 = arith.constant 0 : i32
    %c0_i32_1 = arith.constant 0 : i32
    return %c0_i32, %c0_i32_0 : i32, i32
  }
  func.func @transform_4(%arg0: i32) -> (i32, i32) {
    %c0_i32 = arith.constant 0 : i32
    %c0_i32_0 = arith.constant 0 : i32
    %c0_i32_1 = arith.constant 0 : i32
    return %c0_i32, %c0_i32_0 : i32, i32
  }
  func.func @transform_5(%arg0: i32) -> (i32, i32) {
    %c0_i32 = arith.constant 0 : i32
    %c0_i32_0 = arith.constant 0 : i32
    %c0_i32_1 = arith.constant 0 : i32
    return %c0_i32, %c0_i32_0 : i32, i32
  }
  func.func @transform_6(%arg0: i32) -> (i32, i32) {
    %c0_i32 = arith.constant 0 : i32
    %c0_i32_0 = arith.constant 0 : i32
    %c0_i32_1 = arith.constant 0 : i32
    return %c0_i32, %c0_i32_0 : i32, i32
  }
  func.func @transform_7(%arg0: i32) -> (i32, i32) {
    %c0_i32 = arith.constant 0 : i32
    %c0_i32_0 = arith.constant 0 : i32
    %c0_i32_1 = arith.constant 0 : i32
    return %c0_i32, %c0_i32_0 : i32, i32
  }
  func.func @transform_8(%arg0: i32) -> (i32, i32) {
    %c0_i32 = arith.constant 0 : i32
    %c0_i32_0 = arith.constant 0 : i32
    %c0_i32_1 = arith.constant 0 : i32
    return %c0_i32, %c0_i32_0 : i32, i32
  }
  func.func @transform_9(%arg0: i32) -> (i32, i32) {
    %c0_i32 = arith.constant 0 : i32
    %c0_i32_0 = arith.constant 0 : i32
    %c0_i32_1 = arith.constant 0 : i32
    return %c0_i32, %c0_i32_0 : i32, i32
  }
  func.func @transform_10(%arg0: i32) -> (i32, i32) {
    %c0_i32 = arith.constant 0 : i32
    %c0_i32_0 = arith.constant 0 : i32
    %c0_i32_1 = arith.constant 0 : i32
    return %c0_i32, %c0_i32_0 : i32, i32
  }
  func.func @transform_11(%arg0: i32) -> (i32, i32) {
    %c0_i32 = arith.constant 0 : i32
    %c0_i32_0 = arith.constant 0 : i32
    %c0_i32_1 = arith.constant 0 : i32
    return %c0_i32, %c0_i32_0 : i32, i32
  }
  func.func @transform_12(%arg0: i32) -> (i32, i32) {
    %c0_i32 = arith.constant 0 : i32
    %c0_i32_0 = arith.constant 0 : i32
    %c0_i32_1 = arith.constant 0 : i32
    return %c0_i32, %c0_i32_0 : i32, i32
  }
  func.func @transform_13(%arg0: i32) -> (i32, i32) {
    %c0_i32 = arith.constant 0 : i32
    %c0_i32_0 = arith.constant 0 : i32
    %c0_i32_1 = arith.constant 0 : i32
    return %c0_i32, %c0_i32_0 : i32, i32
  }
  func.func @transform_14(%arg0: i32) -> (i32, i32) {
    %c0_i32 = arith.constant 0 : i32
    %c0_i32_0 = arith.constant 0 : i32
    %c0_i32_1 = arith.constant 0 : i32
    return %c0_i32, %c0_i32_0 : i32, i32
  }
  func.func @transform_15(%arg0: i32) -> (i32, i32) {
    %c0_i32 = arith.constant 0 : i32
    %c0_i32_0 = arith.constant 0 : i32
    %c0_i32_1 = arith.constant 0 : i32
    return %c0_i32, %c0_i32_0 : i32, i32
  }
  func.func @transform_16(%arg0: i32) -> (i32, i32) {
    %c0_i32 = arith.constant 0 : i32
    %c0_i32_0 = arith.constant 0 : i32
    %c0_i32_1 = arith.constant 0 : i32
    return %c0_i32, %c0_i32_0 : i32, i32
  }
  func.func @transform_17(%arg0: i32) -> (i32, i32) {
    %c0_i32 = arith.constant 0 : i32
    %c0_i32_0 = arith.constant 0 : i32
    %c0_i32_1 = arith.constant 0 : i32
    return %c0_i32, %c0_i32_0 : i32, i32
  }
  func.func @transform_18(%arg0: i32) -> (i32, i32) {
    %c0_i32 = arith.constant 0 : i32
    %c0_i32_0 = arith.constant 0 : i32
    %c0_i32_1 = arith.constant 0 : i32
    return %c0_i32, %c0_i32_0 : i32, i32
  }
  func.func @transform_19(%arg0: i32) -> (i32, i32, i32) {
    %c0_i32 = arith.constant 0 : i32
    %c0_i32_0 = arith.constant 0 : i32
    %c0_i32_1 = arith.constant 0 : i32
    return %arg0, %c0_i32, %c0_i32_0 : i32, i32, i32
  }
}

module attributes {stable_mosaic.version = 11 : i64} {
  func.func @encoder_layer_kernel(%arg0: i32, %arg1: memref<1x8x32xf32, #tpu.memory_space<vmem>>, %arg2: memref<1x1x8xf32, #tpu.memory_space<vmem>>, %arg3: memref<1x8x1xf32, #tpu.memory_space<vmem>>, %arg4: memref<32x32xbf16, #tpu.memory_space<vmem>>, %arg5: memref<1x32xf32, #tpu.memory_space<vmem>>, %arg6: memref<32x32xbf16, #tpu.memory_space<vmem>>, %arg7: memref<1x32xf32, #tpu.memory_space<vmem>>, %arg8: memref<32x32xbf16, #tpu.memory_space<vmem>>, %arg9: memref<1x32xf32, #tpu.memory_space<vmem>>, %arg10: memref<32x32xbf16, #tpu.memory_space<vmem>>, %arg11: memref<1x32xf32, #tpu.memory_space<vmem>>, %arg12: memref<1x32xf32, #tpu.memory_space<vmem>>, %arg13: memref<1x32xf32, #tpu.memory_space<vmem>>, %arg14: memref<32x64xbf16, #tpu.memory_space<vmem>>, %arg15: memref<1x64xf32, #tpu.memory_space<vmem>>, %arg16: memref<64x32xbf16, #tpu.memory_space<vmem>>, %arg17: memref<1x32xf32, #tpu.memory_space<vmem>>, %arg18: memref<1x32xf32, #tpu.memory_space<vmem>>, %arg19: memref<1x32xf32, #tpu.memory_space<vmem>>, %arg20: memref<1x8x32xf32, #tpu.memory_space<vmem>>) attributes {dimension_semantics = [#tpu.dimension_semantics<parallel>], iteration_bounds = array<i64: 2>, scalar_prefetch = 0 : i64, scratch_operands = 0 : i64, tpu.core_type = #tpu.core_type<tc>, window_params = [{transform_indices = @transform_0, window_bounds = array<i64: 1, 8, 32>}, {transform_indices = @transform_1, window_bounds = array<i64: 1, 1, 8>}, {transform_indices = @transform_2, window_bounds = array<i64: 1, 8, 1>}, {pipeline_mode = #tpu.pipeline_mode<synchronous>, transform_indices = @transform_3, window_bounds = array<i64: 32, 32>}, {pipeline_mode = #tpu.pipeline_mode<synchronous>, transform_indices = @transform_4, window_bounds = array<i64: 1, 32>}, {pipeline_mode = #tpu.pipeline_mode<synchronous>, transform_indices = @transform_5, window_bounds = array<i64: 32, 32>}, {pipeline_mode = #tpu.pipeline_mode<synchronous>, transform_indices = @transform_6, window_bounds = array<i64: 1, 32>}, {pipeline_mode = #tpu.pipeline_mode<synchronous>, transform_indices = @transform_7, window_bounds = array<i64: 32, 32>}, {pipeline_mode = #tpu.pipeline_mode<synchronous>, transform_indices = @transform_8, window_bounds = array<i64: 1, 32>}, {pipeline_mode = #tpu.pipeline_mode<synchronous>, transform_indices = @transform_9, window_bounds = array<i64: 32, 32>}, {pipeline_mode = #tpu.pipeline_mode<synchronous>, transform_indices = @transform_10, window_bounds = array<i64: 1, 32>}, {pipeline_mode = #tpu.pipeline_mode<synchronous>, transform_indices = @transform_11, window_bounds = array<i64: 1, 32>}, {pipeline_mode = #tpu.pipeline_mode<synchronous>, transform_indices = @transform_12, window_bounds = array<i64: 1, 32>}, {pipeline_mode = #tpu.pipeline_mode<synchronous>, transform_indices = @transform_13, window_bounds = array<i64: 32, 64>}, {pipeline_mode = #tpu.pipeline_mode<synchronous>, transform_indices = @transform_14, window_bounds = array<i64: 1, 64>}, {pipeline_mode = #tpu.pipeline_mode<synchronous>, transform_indices = @transform_15, window_bounds = array<i64: 64, 32>}, {pipeline_mode = #tpu.pipeline_mode<synchronous>, transform_indices = @transform_16, window_bounds = array<i64: 1, 32>}, {pipeline_mode = #tpu.pipeline_mode<synchronous>, transform_indices = @transform_17, window_bounds = array<i64: 1, 32>}, {pipeline_mode = #tpu.pipeline_mode<synchronous>, transform_indices = @transform_18, window_bounds = array<i64: 1, 32>}, {transform_indices = @transform_19, window_bounds = array<i64: 1, 8, 32>}]} {
    %c0 = arith.constant 0 : index
    %c0_0 = arith.constant 0 : index
    %c0_1 = arith.constant 0 : index
    %0 = vector.load %arg1[%c0, %c0_0, %c0_1] : memref<1x8x32xf32, #tpu.memory_space<vmem>>, vector<1x8x32xf32>
    %1 = vector.shape_cast %0 : vector<1x8x32xf32> to vector<8x32xf32>
    %c0_2 = arith.constant 0 : index
    %c0_3 = arith.constant 0 : index
    %c0_4 = arith.constant 0 : index
    %2 = vector.load %arg2[%c0_2, %c0_3, %c0_4] : memref<1x1x8xf32, #tpu.memory_space<vmem>>, vector<1x1x8xf32>
    %3 = vector.shape_cast %2 : vector<1x1x8xf32> to vector<1x8xf32>
    %c0_5 = arith.constant 0 : index
    %c0_6 = arith.constant 0 : index
    %c0_7 = arith.constant 0 : index
    %4 = vector.load %arg3[%c0_5, %c0_6, %c0_7] : memref<1x8x1xf32, #tpu.memory_space<vmem>>, vector<1x8x1xf32>
    %5 = vector.shape_cast %4 : vector<1x8x1xf32> to vector<8x1xf32>
    %6 = arith.truncf %1 : vector<8x32xf32> to vector<8x32xbf16>
    %c0_8 = arith.constant 0 : index
    %c0_9 = arith.constant 0 : index
    %7 = vector.load %arg4[%c0_8, %c0_9] : memref<32x32xbf16, #tpu.memory_space<vmem>>, vector<32x32xbf16>
    %cst = arith.constant dense<0.000000e+00> : vector<8x32xf32>
    %8 = tpu.matmul %6, %7, %cst {dimension_numbers = #tpu.dot_dimension_numbers<[1], [0], [0], [1], [0, 0, 1, 1], [], []>} : vector<8x32xbf16>, vector<32x32xbf16>, vector<8x32xf32> -> vector<8x32xf32>
    %c0_10 = arith.constant 0 : index
    %c0_11 = arith.constant 0 : index
    %9 = vector.load %arg5[%c0_10, %c0_11] : memref<1x32xf32, #tpu.memory_space<vmem>>, vector<1x32xf32>
    %10 = vector.broadcast %9 : vector<1x32xf32> to vector<8x32xf32>
    %11 = arith.addf %8, %10 : vector<8x32xf32>
    %12 = arith.truncf %11 : vector<8x32xf32> to vector<8x32xbf16>
    %c0_12 = arith.constant 0 : index
    %c0_13 = arith.constant 0 : index
    %13 = vector.load %arg6[%c0_12, %c0_13] : memref<32x32xbf16, #tpu.memory_space<vmem>>, vector<32x32xbf16>
    %cst_14 = arith.constant dense<0.000000e+00> : vector<8x32xf32>
    %14 = tpu.matmul %6, %13, %cst_14 {dimension_numbers = #tpu.dot_dimension_numbers<[1], [0], [0], [1], [0, 0, 1, 1], [], []>} : vector<8x32xbf16>, vector<32x32xbf16>, vector<8x32xf32> -> vector<8x32xf32>
    %c0_15 = arith.constant 0 : index
    %c0_16 = arith.constant 0 : index
    %15 = vector.load %arg7[%c0_15, %c0_16] : memref<1x32xf32, #tpu.memory_space<vmem>>, vector<1x32xf32>
    %16 = vector.broadcast %15 : vector<1x32xf32> to vector<8x32xf32>
    %17 = arith.addf %14, %16 : vector<8x32xf32>
    %18 = arith.truncf %17 : vector<8x32xf32> to vector<8x32xbf16>
    %c0_17 = arith.constant 0 : index
    %c0_18 = arith.constant 0 : index
    %19 = vector.load %arg8[%c0_17, %c0_18] : memref<32x32xbf16, #tpu.memory_space<vmem>>, vector<32x32xbf16>
    %cst_19 = arith.constant dense<0.000000e+00> : vector<8x32xf32>
    %20 = tpu.matmul %6, %19, %cst_19 {dimension_numbers = #tpu.dot_dimension_numbers<[1], [0], [0], [1], [0, 0, 1, 1], [], []>} : vector<8x32xbf16>, vector<32x32xbf16>, vector<8x32xf32> -> vector<8x32xf32>
    %c0_20 = arith.constant 0 : index
    %c0_21 = arith.constant 0 : index
    %21 = vector.load %arg9[%c0_20, %c0_21] : memref<1x32xf32, #tpu.memory_space<vmem>>, vector<1x32xf32>
    %22 = vector.broadcast %21 : vector<1x32xf32> to vector<8x32xf32>
    %23 = arith.addf %20, %22 : vector<8x32xf32>
    %24 = arith.truncf %23 : vector<8x32xf32> to vector<8x32xbf16>
    %25 = vector.extract_strided_slice %12 {offsets = [0, 0], sizes = [8, 16], strides = [1, 1]} : vector<8x32xbf16> to vector<8x16xbf16>
    %26 = vector.extract_strided_slice %12 {offsets = [0, 16], sizes = [8, 16], strides = [1, 1]} : vector<8x32xbf16> to vector<8x16xbf16>
    %27 = vector.shape_cast %25 : vector<8x16xbf16> to vector<1x8x16xbf16>
    %28 = vector.shape_cast %26 : vector<8x16xbf16> to vector<1x8x16xbf16>
    %29 = tpu.concatenate %27, %28 in 0 : vector<1x8x16xbf16>, vector<1x8x16xbf16> -> vector<2x8x16xbf16>
    %30 = vector.extract_strided_slice %18 {offsets = [0, 0], sizes = [8, 16], strides = [1, 1]} : vector<8x32xbf16> to vector<8x16xbf16>
    %31 = vector.extract_strided_slice %18 {offsets = [0, 16], sizes = [8, 16], strides = [1, 1]} : vector<8x32xbf16> to vector<8x16xbf16>
    %32 = vector.shape_cast %30 : vector<8x16xbf16> to vector<1x8x16xbf16>
    %33 = vector.shape_cast %31 : vector<8x16xbf16> to vector<1x8x16xbf16>
    %34 = tpu.concatenate %32, %33 in 0 : vector<1x8x16xbf16>, vector<1x8x16xbf16> -> vector<2x8x16xbf16>
    %35 = vector.extract_strided_slice %24 {offsets = [0, 0], sizes = [8, 16], strides = [1, 1]} : vector<8x32xbf16> to vector<8x16xbf16>
    %36 = vector.extract_strided_slice %24 {offsets = [0, 16], sizes = [8, 16], strides = [1, 1]} : vector<8x32xbf16> to vector<8x16xbf16>
    %37 = vector.shape_cast %35 : vector<8x16xbf16> to vector<1x8x16xbf16>
    %38 = vector.shape_cast %36 : vector<8x16xbf16> to vector<1x8x16xbf16>
    %39 = tpu.concatenate %37, %38 in 0 : vector<1x8x16xbf16>, vector<1x8x16xbf16> -> vector<2x8x16xbf16>
    "tpu.trace_start"() <{level = 10 : i32, message = "hqd,hkd->hqk"}> : () -> ()
    %cst_22 = arith.constant dense<0.000000e+00> : vector<2x8x8xf32>
    %40 = tpu.matmul %29, %34, %cst_22 {dimension_numbers = #tpu.dot_dimension_numbers<[2], [2], [1], [1], [0, 0, 0, 1, 1, 1], [0], [0]>} : vector<2x8x16xbf16>, vector<2x8x16xbf16>, vector<2x8x8xf32> -> vector<2x8x8xf32>
    "tpu.trace_stop"() : () -> ()
    %cst_23 = arith.constant 2.500000e-01 : f32
    %41 = vector.broadcast %cst_23 : f32 to vector<2x8x8xf32>
    %42 = arith.mulf %40, %41 : vector<2x8x8xf32>
    %43 = vector.shape_cast %3 : vector<1x8xf32> to vector<1x1x8xf32>
    %44 = vector.broadcast %43 : vector<1x1x8xf32> to vector<2x8x8xf32>
    %45 = arith.addf %42, %44 : vector<2x8x8xf32>
    %cst_24 = arith.constant dense<0xFF800000> : vector<2x8xf32>
    %46 = vector.multi_reduction <maximumf>, %45, %cst_24 [2] : vector<2x8x8xf32> to vector<2x8xf32>
    %47 = vector.shape_cast %46 : vector<2x8xf32> to vector<2x8x1xf32>
    %48 = vector.broadcast %47 : vector<2x8x1xf32> to vector<2x8x8xf32>
    %49 = arith.subf %45, %48 : vector<2x8x8xf32>
    %50 = math.exp %49 : vector<2x8x8xf32>
    %cst_25 = arith.constant dense<0.000000e+00> : vector<2x8xf32>
    %51 = vector.multi_reduction <add>, %50, %cst_25 [2] : vector<2x8x8xf32> to vector<2x8xf32>
    %52 = vector.shape_cast %51 : vector<2x8xf32> to vector<2x8x1xf32>
    %53 = tpu.reciprocal %52 {approx = true} : vector<2x8x1xf32> -> vector<2x8x1xf32>
    %54 = vector.broadcast %53 : vector<2x8x1xf32> to vector<2x8x8xf32>
    %55 = arith.mulf %50, %54 : vector<2x8x8xf32>
    %56 = arith.truncf %55 : vector<2x8x8xf32> to vector<2x8x8xbf16>
    "tpu.trace_start"() <{level = 10 : i32, message = "hqk,hkd->hqd"}> : () -> ()
    %cst_26 = arith.constant dense<0.000000e+00> : vector<2x8x16xf32>
    %57 = tpu.matmul %56, %39, %cst_26 {dimension_numbers = #tpu.dot_dimension_numbers<[2], [1], [1], [2], [0, 0, 0, 1, 1, 2], [0], [0]>} : vector<2x8x8xbf16>, vector<2x8x16xbf16>, vector<2x8x16xf32> -> vector<2x8x16xf32>
    "tpu.trace_stop"() : () -> ()
    %58 = vector.extract_strided_slice %57 {offsets = [0, 0, 0], sizes = [1, 8, 16], strides = [1, 1, 1]} : vector<2x8x16xf32> to vector<1x8x16xf32>
    %59 = vector.shape_cast %58 : vector<1x8x16xf32> to vector<8x16xf32>
    %60 = vector.extract_strided_slice %57 {offsets = [1, 0, 0], sizes = [1, 8, 16], strides = [1, 1, 1]} : vector<2x8x16xf32> to vector<1x8x16xf32>
    %61 = vector.shape_cast %60 : vector<1x8x16xf32> to vector<8x16xf32>
    %62 = tpu.concatenate %59, %61 in 1 : vector<8x16xf32>, vector<8x16xf32> -> vector<8x32xf32>
    %63 = arith.truncf %62 : vector<8x32xf32> to vector<8x32xbf16>
    %c0_27 = arith.constant 0 : index
    %c0_28 = arith.constant 0 : index
    %64 = vector.load %arg10[%c0_27, %c0_28] : memref<32x32xbf16, #tpu.memory_space<vmem>>, vector<32x32xbf16>
    %cst_29 = arith.constant dense<0.000000e+00> : vector<8x32xf32>
    %65 = tpu.matmul %63, %64, %cst_29 {dimension_numbers = #tpu.dot_dimension_numbers<[1], [0], [0], [1], [0, 0, 1, 1], [], []>} : vector<8x32xbf16>, vector<32x32xbf16>, vector<8x32xf32> -> vector<8x32xf32>
    %c0_30 = arith.constant 0 : index
    %c0_31 = arith.constant 0 : index
    %66 = vector.load %arg11[%c0_30, %c0_31] : memref<1x32xf32, #tpu.memory_space<vmem>>, vector<1x32xf32>
    %67 = vector.broadcast %66 : vector<1x32xf32> to vector<8x32xf32>
    %68 = arith.addf %65, %67 : vector<8x32xf32>
    %69 = arith.addf %68, %1 : vector<8x32xf32>
    %c0_32 = arith.constant 0 : index
    %c0_33 = arith.constant 0 : index
    %70 = vector.load %arg12[%c0_32, %c0_33] : memref<1x32xf32, #tpu.memory_space<vmem>>, vector<1x32xf32>
    %c0_34 = arith.constant 0 : index
    %c0_35 = arith.constant 0 : index
    %71 = vector.load %arg13[%c0_34, %c0_35] : memref<1x32xf32, #tpu.memory_space<vmem>>, vector<1x32xf32>
    %cst_36 = arith.constant dense<0.000000e+00> : vector<8xf32>
    %72 = vector.multi_reduction <add>, %69, %cst_36 [1] : vector<8x32xf32> to vector<8xf32>
    %73 = vector.shape_cast %72 : vector<8xf32> to vector<8x1xf32>
    %cst_37 = arith.constant 3.200000e+01 : f32
    %74 = vector.broadcast %cst_37 : f32 to vector<8x1xf32>
    %75 = arith.divf %73, %74 : vector<8x1xf32>
    %76 = vector.broadcast %75 : vector<8x1xf32> to vector<8x32xf32>
    %77 = arith.subf %69, %76 : vector<8x32xf32>
    %78 = arith.mulf %77, %77 : vector<8x32xf32>
    %cst_38 = arith.constant dense<0.000000e+00> : vector<8xf32>
    %79 = vector.multi_reduction <add>, %78, %cst_38 [1] : vector<8x32xf32> to vector<8xf32>
    %80 = vector.shape_cast %79 : vector<8xf32> to vector<8x1xf32>
    %cst_39 = arith.constant 3.200000e+01 : f32
    %81 = vector.broadcast %cst_39 : f32 to vector<8x1xf32>
    %82 = arith.divf %80, %81 : vector<8x1xf32>
    %83 = vector.broadcast %75 : vector<8x1xf32> to vector<8x32xf32>
    %84 = arith.subf %69, %83 : vector<8x32xf32>
    %cst_40 = arith.constant 9.99999974E-6 : f32
    %85 = vector.broadcast %cst_40 : f32 to vector<8x1xf32>
    %86 = arith.addf %82, %85 : vector<8x1xf32>
    %87 = math.rsqrt %86 : vector<8x1xf32>
    %88 = vector.broadcast %87 : vector<8x1xf32> to vector<8x32xf32>
    %89 = arith.mulf %84, %88 : vector<8x32xf32>
    %90 = vector.broadcast %70 : vector<1x32xf32> to vector<8x32xf32>
    %91 = arith.mulf %89, %90 : vector<8x32xf32>
    %92 = vector.broadcast %71 : vector<1x32xf32> to vector<8x32xf32>
    %93 = arith.addf %91, %92 : vector<8x32xf32>
    %94 = vector.broadcast %5 : vector<8x1xf32> to vector<8x32xf32>
    %95 = arith.mulf %93, %94 : vector<8x32xf32>
    %96 = arith.truncf %95 : vector<8x32xf32> to vector<8x32xbf16>
    %c0_41 = arith.constant 0 : index
    %c0_42 = arith.constant 0 : index
    %97 = vector.load %arg14[%c0_41, %c0_42] : memref<32x64xbf16, #tpu.memory_space<vmem>>, vector<32x64xbf16>
    %cst_43 = arith.constant dense<0.000000e+00> : vector<8x64xf32>
    %98 = tpu.matmul %96, %97, %cst_43 {dimension_numbers = #tpu.dot_dimension_numbers<[1], [0], [0], [1], [0, 0, 1, 1], [], []>} : vector<8x32xbf16>, vector<32x64xbf16>, vector<8x64xf32> -> vector<8x64xf32>
    %c0_44 = arith.constant 0 : index
    %c0_45 = arith.constant 0 : index
    %99 = vector.load %arg15[%c0_44, %c0_45] : memref<1x64xf32, #tpu.memory_space<vmem>>, vector<1x64xf32>
    %100 = vector.broadcast %99 : vector<1x64xf32> to vector<8x64xf32>
    %101 = arith.addf %98, %100 : vector<8x64xf32>
    %cst_46 = arith.constant 0.000000e+00 : f32
    %102 = vector.broadcast %cst_46 : f32 to vector<8x64xf32>
    %103 = arith.maximumf %101, %102 : vector<8x64xf32>
    %104 = arith.truncf %103 : vector<8x64xf32> to vector<8x64xbf16>
    %c0_47 = arith.constant 0 : index
    %c0_48 = arith.constant 0 : index
    %105 = vector.load %arg16[%c0_47, %c0_48] : memref<64x32xbf16, #tpu.memory_space<vmem>>, vector<64x32xbf16>
    %cst_49 = arith.constant dense<0.000000e+00> : vector<8x32xf32>
    %106 = tpu.matmul %104, %105, %cst_49 {dimension_numbers = #tpu.dot_dimension_numbers<[1], [0], [0], [1], [0, 0, 1, 1], [], []>} : vector<8x64xbf16>, vector<64x32xbf16>, vector<8x32xf32> -> vector<8x32xf32>
    %c0_50 = arith.constant 0 : index
    %c0_51 = arith.constant 0 : index
    %107 = vector.load %arg17[%c0_50, %c0_51] : memref<1x32xf32, #tpu.memory_space<vmem>>, vector<1x32xf32>
    %108 = vector.broadcast %107 : vector<1x32xf32> to vector<8x32xf32>
    %109 = arith.addf %106, %108 : vector<8x32xf32>
    %110 = arith.addf %109, %95 : vector<8x32xf32>
    %c0_52 = arith.constant 0 : index
    %c0_53 = arith.constant 0 : index
    %111 = vector.load %arg18[%c0_52, %c0_53] : memref<1x32xf32, #tpu.memory_space<vmem>>, vector<1x32xf32>
    %c0_54 = arith.constant 0 : index
    %c0_55 = arith.constant 0 : index
    %112 = vector.load %arg19[%c0_54, %c0_55] : memref<1x32xf32, #tpu.memory_space<vmem>>, vector<1x32xf32>
    %cst_56 = arith.constant dense<0.000000e+00> : vector<8xf32>
    %113 = vector.multi_reduction <add>, %110, %cst_56 [1] : vector<8x32xf32> to vector<8xf32>
    %114 = vector.shape_cast %113 : vector<8xf32> to vector<8x1xf32>
    %cst_57 = arith.constant 3.200000e+01 : f32
    %115 = vector.broadcast %cst_57 : f32 to vector<8x1xf32>
    %116 = arith.divf %114, %115 : vector<8x1xf32>
    %117 = vector.broadcast %116 : vector<8x1xf32> to vector<8x32xf32>
    %118 = arith.subf %110, %117 : vector<8x32xf32>
    %119 = arith.mulf %118, %118 : vector<8x32xf32>
    %cst_58 = arith.constant dense<0.000000e+00> : vector<8xf32>
    %120 = vector.multi_reduction <add>, %119, %cst_58 [1] : vector<8x32xf32> to vector<8xf32>
    %121 = vector.shape_cast %120 : vector<8xf32> to vector<8x1xf32>
    %cst_59 = arith.constant 3.200000e+01 : f32
    %122 = vector.broadcast %cst_59 : f32 to vector<8x1xf32>
    %123 = arith.divf %121, %122 : vector<8x1xf32>
    %124 = vector.broadcast %116 : vector<8x1xf32> to vector<8x32xf32>
    %125 = arith.subf %110, %124 : vector<8x32xf32>
    %cst_60 = arith.constant 9.99999974E-6 : f32
    %126 = vector.broadcast %cst_60 : f32 to vector<8x1xf32>
    %127 = arith.addf %123, %126 : vector<8x1xf32>
    %128 = math.rsqrt %127 : vector<8x1xf32>
    %129 = vector.broadcast %128 : vector<8x1xf32> to vector<8x32xf32>
    %130 = arith.mulf %125, %129 : vector<8x32xf32>
    %131 = vector.broadcast %111 : vector<1x32xf32> to vector<8x32xf32>
    %132 = arith.mulf %130, %131 : vector<8x32xf32>
    %133 = vector.broadcast %112 : vector<1x32xf32> to vector<8x32xf32>
    %134 = arith.addf %132, %133 : vector<8x32xf32>
    %135 = vector.broadcast %5 : vector<8x1xf32> to vector<8x32xf32>
    %136 = arith.mulf %134, %135 : vector<8x32xf32>
    %c0_61 = arith.constant 0 : index
    %c0_62 = arith.constant 0 : index
    %c0_63 = arith.constant 0 : index
    %137 = vector.load %arg20[%c0_61, %c0_62, %c0_63] : memref<1x8x32xf32, #tpu.memory_space<vmem>>, vector<1x8x32xf32>
    %138 = vector.shape_cast %137 : vector<1x8x32xf32> to vector<8x32xf32>
    %139 = vector.shape_cast %136 : vector<8x32xf32> to vector<1x8x32xf32>
    tpu.vector_store %arg20[%c0_61, %c0_62, %c0_63], %139 {strides = array<i32>} : memref<1x8x32xf32, #tpu.memory_space<vmem>>, vector<1x8x32xf32>,
    return
  }
  func.func @transform_0(%arg0: i32) -> (i32, i32, i32) {
    %c0_i32 = arith.constant 0 : i32
    %c0_i32_0 = arith.constant 0 : i32
    %c0_i32_1 = arith.constant 0 : i32
    return %arg0, %c0_i32, %c0_i32_0 : i32, i32, i32
  }
  func.func @transform_1(%arg0: i32) -> (i32, i32, i32) {
    %c0_i32 = arith.constant 0 : i32
    %c0_i32_0 = arith.constant 0 : i32
    %c0_i32_1 = arith.constant 0 : i32
    return %arg0, %c0_i32, %c0_i32_0 : i32, i32, i32
  }
  func.func @transform_2(%arg0: i32) -> (i32, i32, i32) {
    %c0_i32 = arith.constant 0 : i32
    %c0_i32_0 = arith.constant 0 : i32
    %c0_i32_1 = arith.constant 0 : i32
    return %arg0, %c0_i32, %c0_i32_0 : i32, i32, i32
  }
  func.func @transform_3(%arg0: i32) -> (i32, i32) {
    %c0_i32 = arith.constant 0 : i32
    %c0_i32_0 = arith.constant 0 : i32
    %c0_i32_1 = arith.constant 0 : i32
    return %c0_i32, %c0_i32_0 : i32, i32
  }
  func.func @transform_4(%arg0: i32) -> (i32, i32) {
    %c0_i32 = arith.constant 0 : i32
    %c0_i32_0 = arith.constant 0 : i32
    %c0_i32_1 = arith.constant 0 : i32
    return %c0_i32, %c0_i32_0 : i32, i32
  }
  func.func @transform_5(%arg0: i32) -> (i32, i32) {
    %c0_i32 = arith.constant 0 : i32
    %c0_i32_0 = arith.constant 0 : i32
    %c0_i32_1 = arith.constant 0 : i32
    return %c0_i32, %c0_i32_0 : i32, i32
  }
  func.func @transform_6(%arg0: i32) -> (i32, i32) {
    %c0_i32 = arith.constant 0 : i32
    %c0_i32_0 = arith.constant 0 : i32
    %c0_i32_1 = arith.constant 0 : i32
    return %c0_i32, %c0_i32_0 : i32, i32
  }
  func.func @transform_7(%arg0: i32) -> (i32, i32) {
    %c0_i32 = arith.constant 0 : i32
    %c0_i32_0 = arith.constant 0 : i32
    %c0_i32_1 = arith.constant 0 : i32
    return %c0_i32, %c0_i32_0 : i32, i32
  }
  func.func @transform_8(%arg0: i32) -> (i32, i32) {
    %c0_i32 = arith.constant 0 : i32
    %c0_i32_0 = arith.constant 0 : i32
    %c0_i32_1 = arith.constant 0 : i32
    return %c0_i32, %c0_i32_0 : i32, i32
  }
  func.func @transform_9(%arg0: i32) -> (i32, i32) {
    %c0_i32 = arith.constant 0 : i32
    %c0_i32_0 = arith.constant 0 : i32
    %c0_i32_1 = arith.constant 0 : i32
    return %c0_i32, %c0_i32_0 : i32, i32
  }
  func.func @transform_10(%arg0: i32) -> (i32, i32) {
    %c0_i32 = arith.constant 0 : i32
    %c0_i32_0 = arith.constant 0 : i32
    %c0_i32_1 = arith.constant 0 : i32
    return %c0_i32, %c0_i32_0 : i32, i32
  }
  func.func @transform_11(%arg0: i32) -> (i32, i32) {
    %c0_i32 = arith.constant 0 : i32
    %c0_i32_0 = arith.constant 0 : i32
    %c0_i32_1 = arith.constant 0 : i32
    return %c0_i32, %c0_i32_0 : i32, i32
  }
  func.func @transform_12(%arg0: i32) -> (i32, i32) {
    %c0_i32 = arith.constant 0 : i32
    %c0_i32_0 = arith.constant 0 : i32
    %c0_i32_1 = arith.constant 0 : i32
    return %c0_i32, %c0_i32_0 : i32, i32
  }
  func.func @transform_13(%arg0: i32) -> (i32, i32) {
    %c0_i32 = arith.constant 0 : i32
    %c0_i32_0 = arith.constant 0 : i32
    %c0_i32_1 = arith.constant 0 : i32
    return %c0_i32, %c0_i32_0 : i32, i32
  }
  func.func @transform_14(%arg0: i32) -> (i32, i32) {
    %c0_i32 = arith.constant 0 : i32
    %c0_i32_0 = arith.constant 0 : i32
    %c0_i32_1 = arith.constant 0 : i32
    return %c0_i32, %c0_i32_0 : i32, i32
  }
  func.func @transform_15(%arg0: i32) -> (i32, i32) {
    %c0_i32 = arith.constant 0 : i32
    %c0_i32_0 = arith.constant 0 : i32
    %c0_i32_1 = arith.constant 0 : i32
    return %c0_i32, %c0_i32_0 : i32, i32
  }
  func.func @transform_16(%arg0: i32) -> (i32, i32) {
    %c0_i32 = arith.constant 0 : i32
    %c0_i32_0 = arith.constant 0 : i32
    %c0_i32_1 = arith.constant 0 : i32
    return %c0_i32, %c0_i32_0 : i32, i32
  }
  func.func @transform_17(%arg0: i32) -> (i32, i32) {
    %c0_i32 = arith.constant 0 : i32
    %c0_i32_0 = arith.constant 0 : i32
    %c0_i32_1 = arith.constant 0 : i32
    return %c0_i32, %c0_i32_0 : i32, i32
  }
  func.func @transform_18(%arg0: i32) -> (i32, i32) {
    %c0_i32 = arith.constant 0 : i32
    %c0_i32_0 = arith.constant 0 : i32
    %c0_i32_1 = arith.constant 0 : i32
    return %c0_i32, %c0_i32_0 : i32, i32
  }
  func.func @transform_19(%arg0: i32) -> (i32, i32, i32) {
    %c0_i32 = arith.constant 0 : i32
    %c0_i32_0 = arith.constant 0 : i32
    %c0_i32_1 = arith.constant 0 : i32
    return %arg0, %c0_i32, %c0_i32_0 : i32, i32, i32
  }
}

</mosaic_0001>

<bundles_post_ra>
// kernel: tpu_custom_call.1
= control target key start
LH: loop header
LB: loop body
LE: loop exit
PB: predicated region body
PF: predicated region fallthrough
CT: control target
= control target key end

     0   :  { %s2495_s0 = inlined_call_operand.vmem [shape: f32[2,8,32], index: 0, kind: input, shape index: {}]   ;;  %s2496_s1 = inlined_call_operand.hbm [shape: f32[2,1,8], index: 1, kind: input, shape index: {}]   ;;  %s2497_s2 = inlined_call_operand.vmem [shape: f32[2,8,1], index: 2, kind: input, shape index: {}]   ;;  %s2498_s3 = inlined_call_operand.vmem [shape: bf16[32,32], index: 3, kind: input, shape index: {}]   ;;  %s2499_s4 = inlined_call_operand.hbm [shape: f32[1,32], index: 4, kind: input, shape index: {}]   ;;  %s2500_s5 = inlined_call_operand.vmem [shape: bf16[32,32], index: 5, kind: input, shape index: {}]   ;;  %s2501_s6 = inlined_call_operand.hbm [shape: f32[1,32], index: 6, kind: input, shape index: {}]   ;;  %s2502_s7 = inlined_call_operand.vmem [shape: bf16[32,32], index: 7, kind: input, shape index: {}]   ;;  %s2503_s8 = inlined_call_operand.hbm [shape: f32[1,32], index: 8, kind: input, shape index: {}]   ;;  %s2504_s9 = inlined_call_operand.hbm [shape: bf16[32,32], index: 9, kind: input, shape index: {}]   ;;  %s2505_s10 = inlined_call_operand.hbm [shape: f32[1,32], index: 10, kind: input, shape index: {}]   ;;  %s2506_s11 = inlined_call_operand.hbm [shape: f32[1,32], index: 11, kind: input, shape index: {}]   ;;  %s2507_s12 = inlined_call_operand.hbm [shape: f32[1,32], index: 12, kind: input, shape index: {}]   ;;  %s2508_s13 = inlined_call_operand.hbm [shape: bf16[32,64], index: 13, kind: input, shape index: {}]   ;;  %s2509_s14 = inlined_call_operand.hbm [shape: f32[1,64], index: 14, kind: input, shape index: {}]   ;;  %s2510_s15 = inlined_call_operand.vmem [shape: bf16[64,32], index: 15, kind: input, shape index: {}]   ;;  %s2511_s16 = inlined_call_operand.vmem [shape: f32[1,32], index: 16, kind: input, shape index: {}]   ;;  %s2512_s17 = inlined_call_operand.vmem [shape: f32[1,32], index: 17, kind: input, shape index: {}]   ;;  %s2513_s18 = inlined_call_operand.vmem [shape: f32[1,32], index: 18, kind: input, shape index: {}]   ;;  %s2514_s19 = inlined_call_operand.hbm [shape: f32[2,8,32], index: 19, kind: output, shape index: {}]  }
   0x1   :  { %2518 = sst [smem:[#allocation27_spill]] %s2495_s0 }
   0x2   :  { %2519 = sst [smem:[#allocation28_spill]] %s2496_s1 }
   0x3   :  { %2520 = sst [smem:[#allocation29_spill]] %s2497_s2 }
   0x4   :  { %2521 = sst [smem:[#allocation30_spill]] %s2498_s3 }
   0x5   :  { %2522 = sst [smem:[#allocation31_spill]] %s2499_s4 }
   0x6   :  { %2523 = sst [smem:[#allocation32_spill]] %s2501_s6 }
   0x7   :  { %2524 = sst [smem:[#allocation33_spill]] %s2503_s8 }
   0x8   :  { %2525 = sst [smem:[#allocation34_spill]] %s2504_s9 }
   0x9   :  { %2526 = sst [smem:[#allocation35_spill]] %s2505_s10 }
   0xa   :  { %2527 = sst [smem:[#allocation36_spill]] %s2506_s11 }
   0xb   :  { %2528 = sst [smem:[#allocation37_spill]] %s2507_s12 }
   0xc   :  { %2529 = sst [smem:[#allocation38_spill]] %s2508_s13 }
   0xd   :  { %2530 = sst [smem:[#allocation39_spill]] %s2512_s17 }
   0xe   :  { %2531 = sst [smem:[#allocation40_spill]] %s2513_s18 }
   0xf   :  { %2532 = sst [smem:[#allocation41_spill]] %s2514_s19 }
  0x10   :  { %24 = vsyncpa [#allocation3], 0 }
  0x11   :  { %26 = vsyncpa [#allocation3 + $0x1], 0 }
  0x12   :  { %27 = vsyncpa [#allocation6], 0 }
  0x13   :  { %28 = vsyncpa [#allocation9], 0 }
  0x14   :  { %29 = vsyncpa [#allocation12], 0 }
  0x15   :  { %30 = vsyncpa [#allocation15], 0 }
  0x16   :  { %31 = vsyncpa [#allocation18], 0 }
  0x17   :  { %32 = vsyncpa [#allocation4], 0 }
  0x18   :  { %34 = vsyncpa [#allocation4 + $0x1], 0  ;;  %s2203_s0 = smov 0   ;;  %s2205_s30 = smov 0  }
  0x19   :  { %s2207_s20 = smov 0   ;;  %s2209_s21 = smov 0  }
  0x1a LB: > { %s2533_s4 = sld [smem:[#allocation31_spill]]  ;;  %s2227_s23 = sadd.s32 4294967295, %s2086_s21   ;;  %s2086_s21 = sphi %s2209_s21, %s2559_s21   ;;  %s2082_s20 = sphi %s2207_s20, %s2558_s20   ;;  %s2078_s30 = sphi %s2205_s30, %s2557_s30   ;;  %s2074_s0 = sphi %s2203_s0, %s2556_s0  }
  0x1b   : > { %p1423_p0 = scmp.ge.s32.totalorder %s2086_s21, 1  ;;  %p87_p1 = scmp.eq.s32.totalorder %s2227_s23, 0 }
  0x1c   : > { %p485_p2 = scmp.lt.s32.totalorder %s2086_s21, 3  ;;  %s2088_s25 = smov [#allocation5]  }
  0x1d   : > { %s502_s3 = sshll.u32 %s2088_s25, 4  ;;  %s2535_s8 = sld [smem:[#allocation33_spill]]  ;;  %s503_s3 = int_to_ptr.vmem [resolvable:$true] %s502_s3 }
  0x1e   : > { %p2232_p3 = pnand %p1423_p0, %p485_p2  ;;  %s2089_s1 = smov [#allocation8]  }
  0x1f   : > { %s532_s22 = sshll.u32 %s2089_s1, 4  ;;  %s2537_s10 = sld [smem:[#allocation35_spill]]  ;;  %s533_s22 = int_to_ptr.vmem [resolvable:$true] %s532_s22 }
  0x20   : > { %s500_s2 = sshll.u32 %s2533_s4, 4  ;;  %p1571_p5 = pneg %p2232_p3  ;;  %s501_s2 = int_to_ptr.hbm [resolvable:$true] %s500_s2 }
  0x21   : > { %s2538_s12 = sld [smem:[#allocation37_spill]]  ;;  %s2090_s18 = smov [#allocation11]  }
  0x22   : > { %p2244_p6 = pnand %p1571_p5, %p87_p1  ;;  %s558_s17 = sshll.u32 %s2090_s18, 4  ;;  %s559_s17 = int_to_ptr.vmem [resolvable:$true] %s558_s17 }
  0x23   : > { %s530_s28 = sshll.u32 %s2535_s8, 4  ;;  %s2091_s1 = smov [#allocation14]   ;;  %s531_s28 = int_to_ptr.hbm [resolvable:$true] %s530_s28 }
  0x24   : > { %1574 = dma.hbm_to_vmem [thread:$0]  (!%p2244_p6), %s501_s2, 16, %s503_s3, [#allocation6]  }
  0x25   : > { %s556_s19 = sshll.u32 %s2537_s10, 4  ;;  %s582_s4 = sshll.u32 %s2091_s1, 4  ;;  %s557_s19 = int_to_ptr.hbm [resolvable:$true] %s556_s19  ;;  %s583_s4 = int_to_ptr.vmem [resolvable:$true] %s582_s4 }
  0x26   : > { %1580 = dma.hbm_to_vmem [thread:$0]  (!%p2244_p6), %s531_s28, 16, %s533_s22, [#allocation9]  }
  0x27   : > { %s580_s8 = sshll.u32 %s2538_s12, 4  ;;  %s2539_s6 = sld [smem:[#allocation32_spill]]  ;;  %s581_s8 = int_to_ptr.hbm [resolvable:$true] %s580_s8 }
  0x28   : > { %1586 = dma.hbm_to_vmem [thread:$0]  (!%p2244_p6), %s557_s19, 16, %s559_s17, [#allocation12]  }
  0x29   : > { %1592 = dma.hbm_to_vmem [thread:$0]  (!%p2244_p6), %s581_s8, 16, %s583_s4, [#allocation15]  }
  0x2a   : > { %s2540_s9 = sld [smem:[#allocation34_spill]]  ;;  %s2092_s18 = smov [#allocation7]  }
  0x2b   : > { %s517_s26 = sshll.u32 %s2092_s18, 4  ;;  %s2093_s17 = smov [#allocation10]   ;;  %s518_s26 = int_to_ptr.vmem [resolvable:$true] %s517_s26 }
  0x2c   : > { %s543_s19 = sshll.u32 %s2093_s17, 4  ;;  %s2094_s10 = smov 64   ;;  %s544_s19 = int_to_ptr.vmem [resolvable:$true] %s543_s19 }
  0x2d   : > { %s515_s2 = sshll.u32 %s2539_s6, 4  ;;  %s2095_s27 = smov 4   ;;  %s516_s2 = int_to_ptr.hbm [resolvable:$true] %s515_s2 }
  0x2e   : > { %1577 = dma.hbm_to_vmem [thread:$0]  (!%p2244_p6), %s516_s2, 16, %s518_s26, [#allocation6]  }
  0x2f   : > { %s2541_s11 = sld [smem:[#allocation36_spill]]  ;;  %s2096_s25 = smov [#allocation13]  }
  0x30   : > { %s541_s22 = sshll.u32 %s2540_s9, 4  ;;  %s570_s3 = sshll.u32 %s2096_s25, 4  ;;  %s542_s22 = int_to_ptr.hbm [resolvable:$true] %s541_s22  ;;  %s571_s3 = int_to_ptr.vmem [resolvable:$true] %s570_s3 }
  0x31   : > { %1583 = dma.hbm_to_vmem [thread:$0]  (!%p2244_p6), %s542_s22, 256, %s544_s19, [#allocation9], %s2094_s10, %s2094_s10, %s2095_s27  }
  0x32   : > { %s2542_s13 = sld [smem:[#allocation38_spill]]  ;;  %s2097_s22 = smov [#allocation16]  }
  0x33   : > { %s593_s26 = sshll.u32 %s2097_s22, 4  ;;  %s606_s8 = sshll.u32 %s2509_s14, 4  ;;  %s594_s26 = int_to_ptr.vmem [resolvable:$true] %s593_s26  ;;  %s607_s8 = int_to_ptr.hbm [resolvable:$true] %s606_s8 }
  0x34   : > { %s2098_s1 = smov [#allocation17]   ;;  %s1422_s25 = sadd.s32 4294967294, %s2086_s21  }
  0x35   : > { %s568_s4 = sshll.u32 %s2541_s11, 4  ;;  %s73_s2 = sadd.s32 1, %s2082_s20  ;;  %s569_s4 = int_to_ptr.hbm [resolvable:$true] %s568_s4 }
  0x36   : > { %1589 = dma.hbm_to_vmem [thread:$0]  (!%p2244_p6), %s569_s4, 16, %s571_s3, [#allocation12]  }
  0x37   : > { %s608_s4 = sshll.u32 %s2098_s1, 4  ;;  %s2289_s3 = sadd.s32 1, %s2086_s21   ;;  %s609_s4 = int_to_ptr.vmem [resolvable:$true] %s608_s4 }
  0x38   : > { %s591_s18 = sshll.u32 %s2542_s13, 4  ;;  %s70_s28 = ssub.s32 %s2086_s21, %s2289_s3  ;;  %s592_s18 = int_to_ptr.hbm [resolvable:$true] %s591_s18 }
  0x39   : > { %1595 = dma.hbm_to_vmem [thread:$0]  (!%p2244_p6), %s592_s18, 256, %s594_s26, [#allocation15], %s2094_s10, %s2094_s10, %s2095_s27  }
  0x3a   : > { %1598 = dma.hbm_to_vmem [thread:$0]  (!%p2244_p6), %s607_s8, 16, %s609_s4, [#allocation18]  }
  0x3b   : > { %p80_p7 = scmp.ne.s32.totalorder %s2082_s20, %s2078_s30  ;;  %p71_p8 = scmp.eq.s32.totalorder %s70_s28, 0 }
  0x3c   : > { %p81_p9 = scmp.eq.s32.totalorder %s2086_s21, 0  ;;  %p86_p10 = scmp.ne.s32.totalorder %s2078_s30, %s2074_s0 }
  0x3d   : > { %p472_p11 = scmp.eq.s32.totalorder %s2227_s23, 1  ;;  %p478_p0 = scmp.eq.s32.totalorder %s1422_s25, 1 }
  0x3e   : > { %s2301_s10 = scalar_select %p71_p8, %s2082_s20, %s73_s2  }
  0x3f   : > { %p2305_p12 = por %p87_p1, %p86_p10  ;;  %p2309_p13 = por %p472_p11, %p80_p7 }
  0x40   : > { %p82_p2 = por %p81_p9, %p80_p7  ;;  %s638_s18 = sand.u32 1, %s2082_s20  }
  0x41   : > { %p2314_p5 = por %p478_p0, %p86_p10  ;;  %p1616_p6 = scmp.lt.s32.totalorder %s2086_s21, 2 }
  0x42   : > { %s2546_s19 = sld [smem:[#allocation28_spill]]  ;;  %s641_s4 = scalar_lea.vmem [#allocation2], %s638_s18 }
  0x43   : > { %s648_s2 = sshll.u32 %s641_s4, 4  ;;  %p2323_p8 = pnand %p1616_p6, %p82_p2  ;;  %s649_s2 = int_to_ptr.vmem [resolvable:$true] %s648_s2 }
  0x44   : > { %s639_s25 = scalar_lea.sflag [#allocation3], %s638_s18 }
  0x45   : > { %p1974_p9 = pneg %p2323_p8 }
  0x48   : > { %s644_s8 = scalar_lea.hbm %s2546_s19, %s2086_s21 }
  0x49   : > { %s646_s1 = sshll.u32 %s644_s8, 4  ;;  %s1977_s8 = scalar_lea.hbm %s2546_s19, 2  ;;  %s647_s1 = int_to_ptr.hbm [resolvable:$true] %s646_s1 }
  0x4a   : > { %s1970_s6 = sshra.s32 %s647_s1, 4  ;;  %s1971_s6 = int_to_ptr.hbm [resolvable:$true] %s1970_s6 }
  0x4b   : > { %s1972_s9 = scalar_lea.hbm %s1971_s6, 1  ;;  %p1978_p0 = scmp.lt.s32.totalorder %s1971_s6, %s2546_s19 }
  0x4c   : > { %p1973_p7 = scmp.ne.s32.totalorder %s1971_s6, %s1972_s9  ;;  %p1979_p2 = scmp.lt.s32.totalorder %s1977_s8, %s1972_s9 }
  0x4e   : > { %p1975_p10 = pnand %p1974_p9, %p1973_p7  ;;  %p1980_p6 = por %p1979_p2, %p1978_p0 }
  0x50   : > { %p1976_p11 = pneg %p1975_p10 }
  0x52   : > { %p1981_p4 = pnand %p1980_p6, %p1976_p11 }
  0x54   : > { %1984 = shalt.err (!%p1981_p4)
}
  0x55   : > { %1602 = dma.hbm_to_vmem [thread:$0]  (!%p2323_p8), %s647_s1, 16, %s649_s2, %s639_s25  }
  0x56   : > { %664 = sbr.rel (%p2232_p3) target bundleno = 1946 (0x79a), region = 96  ;;  %s2340_s18 = sand.u32 (!%p2232_p3), 1, %s2078_s30  }
  0x57   : > { %s667_s26 = scalar_lea.sflag (!%p2232_p3), [#allocation3], %s2340_s18 }
  0x5b   : > { %2045 = dma.done.wait (%p2305_p12), %s667_s26, 16  }
  0x5c   : > { %2047 = vsyncadd (%p2305_p12), %s667_s26, 4294967280 }
  0x5d   : > { %2049 = dma.done.wait (%p87_p1), [#allocation6], 32  }
  0x5e   : > { %2051 = vsyncadd (%p87_p1), [#allocation6], 4294967264 }
  0x5f   : > { %2053 = dma.done.wait (%p87_p1), [#allocation9], 272  }
  0x60   : > { %2055 = vsyncadd (%p87_p1), [#allocation9], 4294967024 }
  0x61   : > { %2057 = dma.done.wait (%p87_p1), [#allocation12], 32  }
  0x62   : > { %2059 = vsyncadd (%p87_p1), [#allocation12], 4294967264 }
  0x63   : > { %2061 = dma.done.wait (%p87_p1), [#allocation15], 272  }
  0x64   : > { %2063 = vsyncadd (%p87_p1), [#allocation15], 4294967024 }
  0x65   : > { %2065 = dma.done.wait (%p87_p1), [#allocation18], 16  }
  0x66   : > { %2067 = vsyncadd (%p87_p1), [#allocation18], 4294967280  ;;  %p777_p3 = scmp.lt.s32.totalorder %s2227_s23, 1  ;;  %s2548_s29 = sld [smem:[#allocation27_spill]]  ;;  %v1520_v1 = vld [vmem:[%s2500_s5 + $0x8] sm:$0xff]  ;;  %v1519_v3 = vld [vmem:[%s2500_s5] sm:$0xff] }
  0x67   : > { %s2549_s25 = sld [smem:[#allocation30_spill]]  ;;  %854 = vmatpush.bf16.msra.mxu1 %v1520_v1  ;;  %vm810_vm0 = vcmask 261120   ;;  %v1676_v6 = vld [vmem:[#allocation7] ss:$0 sm:$0xff]  ;;  %v1675_v9 = vld [vmem:[#allocation5] ss:$0 sm:$0xff] }
  0x68   : > { %s2370_s6 = scalar_select %p777_p3, %s2227_s23, 1  ;;  %vm905_vm1 = vcmask 130048   ;;  %v1522_v22 = vld [vmem:[%s2502_s7 + $0x8] sm:$0xff]  ;;  %v1521_v23 = vld [vmem:[%s2502_s7] sm:$0xff]  ;;  %vm951_vm2 = vcmask 64512   ;;  %vm979_vm3 = vcmask 1043456  }
  0x69   : > { %s2099_s12 = smov 112   ;;  %888 = vmatpush.bf16.msra.mxu2 %v1522_v22  ;;  %v1678_v33 = vld [vmem:[#allocation8] ss:$0 sm:$0xff]  ;;  %v1524_v59 = vld [vmem:[#allocation10 + $0x8] sm:$0xff]  ;;  %s2551_s8 = sld [smem:[#allocation29_spill]]  ;;  %vm1178_vm8 = vcmask 523264  }
  0x6a   : > { %s1445_s9 = sshll.u32 %s2370_s6, 3  ;;  %s1444_s2 = sshll.u32 %s2340_s18, 3 }
  0x6b   : > { %855 = vmatpush.bf16.msra.mxu1 %v1519_v3  ;;  %s1514_s28 = sshll.u32 %s2227_s23, 3  ;;  %s2552_s6 = sld [smem:[#allocation39_spill]] }
  0x6c   : > { %s780_s1 = scalar_lea.vmem %s2548_s29, %s1445_s9  ;;  %s2550_s29 = scalar_lea.vmem [#allocation2], %s2340_s18 }
  0x6d   : > { %v1518_v0 = vld [vmem:[%s2549_s25 + $0x8] sm:$0xff]  ;;  %v1517_v2 = vld [vmem:[%s2549_s25] sm:$0xff]  ;;  %889 = vmatpush.bf16.msra.mxu2 %v1521_v23  ;;  %s2554_s11 = sld [smem:[#allocation41_spill]] }
  0x6e   : > { %820 = vmatpush.bf16.msra.mxu0 %v1518_v0  ;;  %v2390_v4 = vld [vmem:[%s780_s1] sm:$0xff]  ;;  %s2100_s1 = smov 16   ;;  %v1523_v0 = vld [vmem:[#allocation10] sm:$0xff] }
  0x6f   : > { %v789_v5 = vpack.c.bf16 %v2390_v4, %v2390_v4  ;;  %v1677_v26 = vld [vmem:[%s2550_s29] ss:$0 sm:$0xff]  ;;  %s784_s4 = scalar_lea.vmem %s2551_s8, %s1445_s9  ;;  %s776_s29 = scalar_lea.vmem [#allocation19], %s1444_s2 }
  0x70   : > { %s1243_s23 = sshll.u32 %s776_s29, 4  ;;  %s1231_s8 = scalar_lea.sflag [#allocation4], %s2340_s18  ;;  %s1244_s23 = int_to_ptr.vmem [resolvable:$true] %s1243_s23 }
  0x71   : > { %1464 = vmatmul.msk.bf16.vlgmr.msra.gmra.mxu1 %vm810_vm0, %v789_v5  ;;  %1473 = vmatmul.msk.bf16.vlgmr.msra.gmra.mxu2 %vm810_vm0, %v789_v5 }
  0x72   : > { %821 = vmatpush.bf16.msra.mxu0 %v1517_v2 }
  0x73   : > { %s1241_s24 = scalar_lea.hbm %s2554_s11, %s1514_s28  ;;  %s2020_s2 = scalar_lea.hbm %s2554_s11, 16 }
  0x75   : > { %1455 = vmatmul.msk.bf16.vlgmr.msra.gmra.mxu0 %vm810_vm0, %v789_v5  ;;  %v1679_v5 = vld [vmem:[#allocation11] ss:$0 sm:$0xff] }
  0xee   : > { %v857_v8 = vpop.f32.mrf.mxu1 }
  0xef   : > { %v858_v10 = vadd.f32 %v1676_v6, %v857_v8 }
  0xf1   : > { %v861_v11 = vpack.c.bf16 %v858_v10, %v858_v10 }
  0xf2   : > { %v823_v7 = vpop.f32.mrf.mxu0 }
  0xf3   : > { %v824_v12 = vadd.f32 %v1675_v9, %v823_v7  ;;  %900 = vrot.lane.b32.xlu0 %v861_v11, %s2099_s12  ;;  %v910_v13 = vsel %vm905_vm1, %v861_v11, 0  ;;  %v2101_v11 = vmov 32.0  }
  0xf4   : > { %919 = vmatpush.bf16.xpose.msra.mxu3 %v910_v13  ;;  %v891_v36 = vpop.f32.mrf.mxu2  ;;  %v2102_v13 = vmov 0  }
  0xf5   : > { %v827_v16 = vpack.c.bf16 %v824_v12, %v824_v12  ;;  %v892_v37 = vadd.f32 %v1678_v33, %v891_v36  ;;  %v788_v12 = vld [vmem:[%s784_s4] sm:$0xff]  ;;  %1674 = vset.pattern.permute.xlu0 %v2102_v13 }
  0xf6   : > { %v859_v15 = vpop.f32.mrf.mxu1 }
  0xf7   : > { %v895_v39 = vpack.c.bf16 %v892_v37, %v892_v37  ;;  %v1680_v37 = vld [vmem:[#allocation13] ss:$0 sm:$0xff] }
  0xf9   : > { %v981_v40 = vsel %vm979_vm3, %v895_v39, 0 }
  0xfa   : > { %v825_v14 = vpop.f32.mrf.mxu0  ;;  %990 = vmatpush.bf16.msrb.mxu1 %v981_v40 }
  0xfb   : > { %897 = vrot.lane.b32.xlu0 %v827_v16, %s2099_s12  ;;  %1474 = vmatmul.msk.bf16.vlgmr.msra.gmra.mxu3 %vm905_vm1, %v827_v16 }
  0xfc   : > { %v893_v43 = vpop.f32.mrf.mxu2  ;;  %1050 = vmatpush.bf16.msrb.mxu3 %v1524_v59 }
 0x100   : > { %1051 = vmatpush.bf16.msrb.mxu3 %v1523_v0 }
 0x165   : > { %v901_v17 = vpop.permute.xlu0 %900 }
 0x166   : > { %v929_v18 = vsel %vm905_vm1, %v901_v17, 0 }
 0x167   : > { %938 = vmatpush.bf16.xpose.msrb.mxu0 %v929_v18 }
 0x16d   : > { %v898_v19 = vpop.permute.xlu0 %897 }
 0x16e   : > { %1475 = vmatmul.msk.bf16.vlgmr.msrb.gmra.mxu0 %vm905_vm1, %v898_v19 }
 0x17e   : > { %v921_v20 = vpop.f32.mrf.mxu3 }
 0x17f   : > { %v944_v28 = vmul.f32 0.25, %v921_v20 }
 0x181   : > { %v949_v31 = vadd.f32 %v1677_v26, %v944_v28  ;;  %v1530_v28 = vld [vmem:[%s2510_s15 + $0x18] sm:$0xff] }
 0x182   : > { %1186 = vmatpush.bf16.msra.mxu1 %v1530_v28 }
 0x183   : > { %v952_v32 = vsel %vm951_vm2, %v949_v31, -inf }
 0x186   : > { %v923_v21 = vpop.f32.mrf.mxu3 }
 0x1eb   : > { %v940_v24 = vpop.f32.mrf.mxu0 }
 0x1ec   : > { %v945_v25 = vmul.f32 0.25, %v940_v24  ;;  %v1526_v24 = vld [vmem:[#allocation16 + $0x8] sm:$0xff] }
 0x1ed   : > { %1133 = vmatpush.bf16.msra.mxu0 %v1526_v24 }
 0x1ee   : > { %v950_v27 = vadd.f32 %v1677_v26, %v945_v25  ;;  %v1525_v25 = vld [vmem:[#allocation16] sm:$0xff] }
 0x1f0   : > { %v955_v29 = vsel %vm951_vm2, %v950_v27, -inf }
 0x1f1   : > { %956 = vmax.xlane.f32.xlu1 %v955_v29  ;;  %1134 = vmatpush.bf16.msra.mxu0 %v1525_v25 }
 0x1f3   : > { %v942_v30 = vpop.f32.mrf.mxu0 }
 0x1f4   : > { %v1529_v30 = vld [vmem:[%s2510_s15 + $0x10] sm:$0xff] }
 0x1f5   : > { %1187 = vmatpush.bf16.msra.mxu1 %v1529_v30 }
 0x1f9   : > { %953 = vmax.xlane.f32.xlu1 %v952_v32 }
 0x264   : > { %v957_v34 = vpop.xlane.xlu1 %956 }
 0x265   : > { %v959_v35 = vsub.f32 %v950_v27, %v957_v34 }
 0x267   : > { %v962_v38 = vmul.f32 1.442695, %v959_v35 }
 0x269   : > { %1686 = vpow2.f32 %v962_v38 }
 0x26c   : > { %v954_v41 = vpop.xlane.xlu1 %953 }
 0x26d   : > { %v958_v42 = vsub.f32 %v949_v31, %v954_v41 }
 0x26f   : > { %v1687_v44 = vpop.eup %1686  ;;  %v960_v45 = vmul.f32 1.442695, %v958_v42 }
 0x270   : > { %v967_v46 = vsel %vm951_vm2, %v1687_v44, 0.0 }
 0x271   : > { %1688 = vpow2.f32 %v960_v45  ;;  %968 = vadd.xlane.f32.xlu2 %v967_v46  ;;  %v1528_v46 = vld [vmem:[%s2510_s15 + $0x8] sm:$0xff] }
 0x272   : > { %1188 = vmatpush.bf16.msra.mxu1 %v1528_v46 }
 0x277   : > { %v1689_v47 = vpop.eup %1688 }
 0x278   : > { %v964_v48 = vsel %vm951_vm2, %v1689_v47, 0.0 }
 0x279   : > { %965 = vadd.xlane.f32.xlu0 %v964_v48  ;;  %v1682_v48 = vld [vmem:[#allocation17] ss:$0 sm:$0xff] }
 0x289   : > { %903 = vrot.lane.b32.xlu2 %v895_v39, %s2099_s12  ;;  %v1681_v39 = vld [vmem:[#allocation14] ss:$0 sm:$0xff]  ;;  %s2553_s12 = sld [smem:[#allocation40_spill]] }
 0x28d   : > { %1099 = vperm.xlu0 %1674, %v788_v12  }
 0x28f   : > { %v1685_v13 = vld [vmem:[%s2553_s12] ss:$0 sm:$0xff] }
 0x2e4   : > { %v969_v49 = vpop.xlane.xlu2 %968 }
 0x2e5   : > { %1690 = vrcp.f32 %v969_v49 }
 0x2eb   : > { %v1691_v50 = vpop.eup %1690 }
 0x2ec   : > { %v973_v51 = vmul.f32 %v1691_v50, %v1687_v44  ;;  %v904_v52 = vpop.permute.xlu2 %903  ;;  %v966_v53 = vpop.xlane.xlu0 %965 }
 0x2ed   : > { %1692 = vrcp.f32 %v966_v53  ;;  %v1000_v54 = vsel %vm979_vm3, %v904_v52, 0 }
 0x2ee   : > { %1009 = vmatpush.bf16.msrb.mxu2 %v1000_v54  ;;  %v975_v55 = vpack.c.bf16 %v973_v51, %v973_v51  ;;  %1694 = vrcp.f32 %v2101_v11  ;;  %v1683_v54 = vld [vmem:[%s2511_s16] ss:$0 sm:$0xff] }
 0x2ef   : > { %v1684_v11 = vld [vmem:[%s2552_s6] ss:$0 sm:$0xff] }
 0x2f1   : > { %1477 = vmatmul.msk.bf16.vlgmr.msrb.gmra.mxu2 %vm951_vm2, %v975_v55 }
 0x2f3   : > { %v1693_v56 = vpop.eup %1692 }
 0x2f4   : > { %v972_v57 = vmul.f32 %v1693_v56, %v1689_v47  ;;  %v1695_v14 = vpop.eup %1694  ;;  %v1527_v47 = vld [vmem:[%s2510_s15] sm:$0xff] }
 0x2f5   : > { %v1064_v15 = vmul.f32 32.0, %v1695_v14  ;;  %vm1068_vm4 = vweird.f32 %v1695_v14  ;;  %1189 = vmatpush.bf16.msra.mxu1 %v1527_v47 }
 0x2f6   : > { %v974_v58 = vpack.c.bf16 %v972_v57, %v972_v57 }
 0x2f7   : > { %v1065_v16 = vsub.f32 1.0, %v1064_v15 }
 0x2f8   : > { %1476 = vmatmul.msk.bf16.vlgmr.msrb.gmra.mxu1 %vm951_vm2, %v974_v58 }
 0x2f9   : > { %v1066_v17 = vmul.f32 %v1695_v14, %v1065_v16 }
 0x2ff   : > { %v1100_v42 = vpop.permute.xlu0 %1099 }
 0x374   : > { %v1011_v60 = vpop.f32.mrf.mxu2 }
 0x375   : > { %1016 = vrot.lane.b32.xlu1 %v1011_v60, %s2100_s1  ;;  %v992_v61 = vpop.f32.mrf.mxu1  ;;  %s1245_s1 = sshll.u32 %s1241_s24, 4  ;;  %s1246_s1 = int_to_ptr.hbm [resolvable:$true] %s1245_s1 }
 0x376   : > { %s2014_s4 = sshra.s32 %s1246_s1, 4  ;;  %s2015_s4 = int_to_ptr.hbm [resolvable:$true] %s2014_s4 }
 0x377   : > { %s2016_s6 = scalar_lea.hbm %s2015_s4, 8  ;;  %p2021_p8 = scmp.lt.s32.totalorder %s2015_s4, %s2554_s11 }
 0x378   : > { %p2017_p1 = scmp.ne.s32.totalorder %s2015_s4, %s2016_s6  ;;  %p2022_p7 = scmp.lt.s32.totalorder %s2020_s2, %s2016_s6 }
 0x37a   : > { %p2018_p4 = pnand %p2017_p1, %p2309_p13  ;;  %p2023_p9 = por %p2022_p7, %p2021_p8 }
 0x37c   : > { %v1013_v62 = vpop.f32.mrf.mxu2  ;;  %p2019_p12 = pneg %p2018_p4 }
 0x37d   : > { %v994_v63 = vpop.f32.mrf.mxu1 }
 0x37e   : > { %p2024_p10 = pnand %p2023_p9, %p2019_p12 }
 0x3e7   : > { %v1017_v1 = vpop.permute.xlu1 %1016 }
 0x3e8   : > { %v1019_v2 = vsel %vm905_vm1, %v992_v61, %v1017_v1 }
 0x3e9   : > { %v1020_v3 = vpack.c.bf16 %v1019_v2, %v1019_v2 }
 0x3eb   : > { %1486 = vmatmul.msk.bf16.vlgmr.msrb.gmra.mxu3 %vm810_vm0, %v1020_v3 }
 0x46e   : > { %v1053_v6 = vpop.f32.mrf.mxu3 }
 0x46f   : > { %v1054_v7 = vadd.f32 %v1679_v5, %v1053_v6 }
 0x471   : > { %v1057_v8 = vadd.f32 %v1054_v7, %v2390_v4  ;;  %v1067_v4 = vadd.f32 %v1695_v14, %v1066_v17 }
 0x473   : > { %v1060_v9 = vsel %vm810_vm0, %v1057_v8, 0.0  ;;  %v2429_v18 = vsel %vm1068_vm4, %v1695_v14, %v1067_v4 }
 0x474   : > { %1061 = vadd.xlane.f32.xlu2 %v1060_v9 }
 0x476   : > { %v1055_v10 = vpop.f32.mrf.mxu3 }
 0x4e7   : > { %v1062_v19 = vpop.xlane.xlu2 %1061 }
 0x4e8   : > { %v1070_v20 = vmul.f32 %v2429_v18, %v1062_v19 }
 0x4ea   : > { %v1071_v21 = vsub.f32 %v1057_v8, %v1070_v20 }
 0x4ec   : > { %v1072_v22 = vmul.f32 %v1071_v21, %v1071_v21 }
 0x4ee   : > { %v1073_v23 = vsel %vm810_vm0, %v1072_v22, 0.0 }
 0x4ef   : > { %1074 = vadd.xlane.f32.xlu1 %v1073_v23 }
 0x562   : > { %v1075_v26 = vpop.xlane.xlu1 %1074 }
 0x563   : > { %v1076_v27 = vmul.f32 %v1075_v26, %v2429_v18 }
 0x565   : > { %v1077_v29 = vadd.f32 1e-05, %v1076_v27 }
 0x567   : > { %1696 = vrsqrt.f32 %v1077_v29  ;;  %vm1084_vm6 = vweird.f32 %v1077_v29 }
 0x56d   : > { %v1697_v31 = vpop.eup %1696 }
 0x56e   : > { %v1079_v32 = vmul.f32 %v1697_v31, %v1077_v29  ;;  %vm1085_vm5 = vweird.f32 %v1697_v31 }
 0x56f   : > { %vm1086_vm7 = vmor %vm1084_vm6, %vm1085_vm5 }
 0x570   : > { %v1080_v33 = vmul.f32 %v1697_v31, %v1079_v32 }
 0x572   : > { %v1081_v34 = vmul.f32 0.5, %v1080_v33 }
 0x574   : > { %v1082_v35 = vsub.f32 1.5, %v1081_v34 }
 0x576   : > { %v1083_v36 = vmul.f32 %v1697_v31, %v1082_v35 }
 0x578   : > { %v1087_v38 = vsel %vm1086_vm7, %v1697_v31, %v1083_v36 }
 0x579   : > { %v1088_v40 = vmul.f32 %v1087_v38, %v1071_v21 }
 0x57b   : > { %v1092_v41 = vmul.f32 %v1680_v37, %v1088_v40 }
 0x57d   : > { %v1096_v43 = vadd.f32 %v1681_v39, %v1092_v41 }
 0x57f   : > { %v1102_v44 = vmul.f32 %v1100_v42, %v1096_v43 }
 0x581   : > { %v1103_v45 = vpack.c.bf16 %v1102_v44, %v1102_v44 }
 0x583   : > { %1495 = vmatmul.msk.bf16.vlgmr.msra.gmra.mxu0 %vm810_vm0, %v1103_v45 }
 0x600   : > { %v1136_v49 = vpop.f32.mrf.mxu0 }
 0x601   : > { %v1137_v50 = vadd.f32 %v1682_v48, %v1136_v49 }
 0x603   : > { %v1140_v51 = vmax.f32 %v1137_v50, 0.0 }
 0x605   : > { %v1141_v52 = vpack.c.bf16 %v1140_v51, %v1140_v51 }
 0x607   : > { %1512 = vmatmul.msk.bf16.vlgmr.msra.gmra.mxu1 %vm1178_vm8, %v1141_v52 }
 0x608   : > { %v1138_v53 = vpop.f32.mrf.mxu0 }
 0x684   : > { %v1191_v55 = vpop.f32.mrf.mxu1 }
 0x685   : > { %v1192_v56 = vadd.f32 %v1683_v54, %v1191_v55 }
 0x687   : > { %v1195_v57 = vadd.f32 %v1192_v56, %v1102_v44 }
 0x689   : > { %v1198_v58 = vsel %vm810_vm0, %v1195_v57, 0.0 }
 0x68a   : > { %1199 = vadd.xlane.f32.xlu2 %v1198_v58 }
 0x68c   : > { %v1193_v59 = vpop.f32.mrf.mxu1 }
 0x6fd   : > { %v1200_v60 = vpop.xlane.xlu2 %1199 }
 0x6fe   : > { %v1201_v61 = vmul.f32 %v1200_v60, %v2429_v18 }
 0x700   : > { %v1202_v62 = vsub.f32 %v1195_v57, %v1201_v61 }
 0x702   : > { %v1203_v63 = vmul.f32 %v1202_v62, %v1202_v62 }
 0x704   : > { %v1204_v0 = vsel %vm810_vm0, %v1203_v63, 0.0 }
 0x705   : > { %1205 = vadd.xlane.f32.xlu2 %v1204_v0 }
 0x778   : > { %v1206_v1 = vpop.xlane.xlu2 %1205 }
 0x779   : > { %v1207_v2 = vmul.f32 %v1206_v1, %v2429_v18 }
 0x77b   : > { %v1208_v3 = vadd.f32 1e-05, %v1207_v2 }
 0x77d   : > { %1698 = vrsqrt.f32 %v1208_v3  ;;  %vm1215_vm10 = vweird.f32 %v1208_v3 }
 0x783   : > { %v1699_v5 = vpop.eup %1698 }
 0x784   : > { %v1210_v6 = vmul.f32 %v1699_v5, %v1208_v3  ;;  %vm1216_vm9 = vweird.f32 %v1699_v5 }
 0x785   : > { %vm1217_vm11 = vmor %vm1215_vm10, %vm1216_vm9 }
 0x786   : > { %v1211_v7 = vmul.f32 %v1699_v5, %v1210_v6 }
 0x788   : > { %v1212_v8 = vmul.f32 0.5, %v1211_v7 }
 0x78a   : > { %v1213_v9 = vsub.f32 1.5, %v1212_v8 }
 0x78c   : > { %v1214_v10 = vmul.f32 %v1699_v5, %v1213_v9 }
 0x78e   : > { %v1218_v12 = vsel %vm1217_vm11, %v1699_v5, %v1214_v10 }
 0x78f   : > { %v1219_v14 = vmul.f32 %v1218_v12, %v1202_v62 }
 0x791   : > { %v1223_v15 = vmul.f32 %v1684_v11, %v1219_v14 }
 0x793   : > { %v1227_v16 = vadd.f32 %v1685_v13, %v1223_v15 }
 0x795   : > { %v1228_v17 = vmul.f32 %v1227_v16, %v1100_v42 }
 0x797   : > { %1229 = vst.msk [vmem:[%s776_s29] sm:$0xff] %vm810_vm0, %v1228_v17 }
 0x798   : > { %2027 = shalt.err (!%p2024_p10)
}
 0x799   : > { %1569 = dma.vmem_to_hbm [thread:$0]  (%p2309_p13), %s1244_s23, 128, %s1246_s1, %s1231_s8  }
 0x79a PF: > { %s1257_s18 = sand.u32 1, %s2074_s0   ;;  %p2555_p11 = scmp.ge.s32.totalorder %s2086_s21, 2 }
 0x79b   : > { %s1258_s13 = scalar_lea.sflag [#allocation4], %s1257_s18 }
 0x79c   : > { %p1604_p0 = pnand %p2555_p11, %p2314_p5 }
 0x79e   : > { %p1605_p2 = pneg %p1604_p0 }
 0x7a0   : > { %2069 = dma.done.wait (%p1605_p2), %s1258_s13, 128  }
 0x7a1   : > { %2071 = vsyncadd (%p1605_p2), %s1258_s13, 4294967168  ;;  %p37_p6 = scmp.ge.s32.totalorder %s2289_s3, 4   ;;  %s2556_s0 = smov %s2078_s30 }
 0x7a2   : > { %s2557_s30 = smov %s2082_s20  ;;  %s2558_s20 = smov %s2301_s10 }
 0x7a3   : > { %s2559_s21 = smov %s2289_s3  ;;  %39 = sbr.rel (!%p37_p6) target bundleno = 26 (0x1a), region = 183 }
 0x7a8   :  { %1264 = vsyncpa [#allocation3], 1 }
 0x7a9   :  { %1266 = vsyncpa [#allocation3 + $0x1], 1 }
 0x7aa   :  { %1267 = vsyncpa [#allocation6], 1 }
 0x7ab   :  { %1268 = vsyncpa [#allocation9], 1 }
 0x7ac   :  { %1269 = vsyncpa [#allocation12], 1 }
 0x7ad   :  { %1270 = vsyncpa [#allocation15], 1 }
 0x7ae   :  { %1271 = vsyncpa [#allocation18], 1 }
 0x7af   :  { %1272 = vsyncpa [#allocation4], 1 }
 0x7b0   :  { %1274 = vsyncpa [#allocation4 + $0x1], 1 }

// kernel: tpu_custom_call.1
= control target key start
LH: loop header
LB: loop body
LE: loop exit
PB: predicated region body
PF: predicated region fallthrough
CT: control target
= control target key end

     0   :  { %s2495_s0 = inlined_call_operand.vmem [shape: f32[2,8,32], index: 0, kind: input, shape index: {}]   ;;  %s2496_s1 = inlined_call_operand.hbm [shape: f32[2,1,8], index: 1, kind: input, shape index: {}]   ;;  %s2497_s2 = inlined_call_operand.vmem [shape: f32[2,8,1], index: 2, kind: input, shape index: {}]   ;;  %s2498_s3 = inlined_call_operand.vmem [shape: bf16[32,32], index: 3, kind: input, shape index: {}]   ;;  %s2499_s4 = inlined_call_operand.hbm [shape: f32[1,32], index: 4, kind: input, shape index: {}]   ;;  %s2500_s5 = inlined_call_operand.vmem [shape: bf16[32,32], index: 5, kind: input, shape index: {}]   ;;  %s2501_s6 = inlined_call_operand.hbm [shape: f32[1,32], index: 6, kind: input, shape index: {}]   ;;  %s2502_s7 = inlined_call_operand.vmem [shape: bf16[32,32], index: 7, kind: input, shape index: {}]   ;;  %s2503_s8 = inlined_call_operand.hbm [shape: f32[1,32], index: 8, kind: input, shape index: {}]   ;;  %s2504_s9 = inlined_call_operand.hbm [shape: bf16[32,32], index: 9, kind: input, shape index: {}]   ;;  %s2505_s10 = inlined_call_operand.hbm [shape: f32[1,32], index: 10, kind: input, shape index: {}]   ;;  %s2506_s11 = inlined_call_operand.hbm [shape: f32[1,32], index: 11, kind: input, shape index: {}]   ;;  %s2507_s12 = inlined_call_operand.hbm [shape: f32[1,32], index: 12, kind: input, shape index: {}]   ;;  %s2508_s13 = inlined_call_operand.hbm [shape: bf16[32,64], index: 13, kind: input, shape index: {}]   ;;  %s2509_s14 = inlined_call_operand.hbm [shape: f32[1,64], index: 14, kind: input, shape index: {}]   ;;  %s2510_s15 = inlined_call_operand.vmem [shape: bf16[64,32], index: 15, kind: input, shape index: {}]   ;;  %s2511_s16 = inlined_call_operand.vmem [shape: f32[1,32], index: 16, kind: input, shape index: {}]   ;;  %s2512_s17 = inlined_call_operand.vmem [shape: f32[1,32], index: 17, kind: input, shape index: {}]   ;;  %s2513_s18 = inlined_call_operand.vmem [shape: f32[1,32], index: 18, kind: input, shape index: {}]   ;;  %s2514_s19 = inlined_call_operand.hbm [shape: f32[2,8,32], index: 19, kind: output, shape index: {}]  }
   0x1   :  { %2518 = sst [smem:[#allocation27_spill]] %s2495_s0 }
   0x2   :  { %2519 = sst [smem:[#allocation28_spill]] %s2496_s1 }
   0x3   :  { %2520 = sst [smem:[#allocation29_spill]] %s2497_s2 }
   0x4   :  { %2521 = sst [smem:[#allocation30_spill]] %s2498_s3 }
   0x5   :  { %2522 = sst [smem:[#allocation31_spill]] %s2499_s4 }
   0x6   :  { %2523 = sst [smem:[#allocation32_spill]] %s2501_s6 }
   0x7   :  { %2524 = sst [smem:[#allocation33_spill]] %s2503_s8 }
   0x8   :  { %2525 = sst [smem:[#allocation34_spill]] %s2504_s9 }
   0x9   :  { %2526 = sst [smem:[#allocation35_spill]] %s2505_s10 }
   0xa   :  { %2527 = sst [smem:[#allocation36_spill]] %s2506_s11 }
   0xb   :  { %2528 = sst [smem:[#allocation37_spill]] %s2507_s12 }
   0xc   :  { %2529 = sst [smem:[#allocation38_spill]] %s2508_s13 }
   0xd   :  { %2530 = sst [smem:[#allocation39_spill]] %s2512_s17 }
   0xe   :  { %2531 = sst [smem:[#allocation40_spill]] %s2513_s18 }
   0xf   :  { %2532 = sst [smem:[#allocation41_spill]] %s2514_s19 }
  0x10   :  { %24 = vsyncpa [#allocation3], 0 }
  0x11   :  { %26 = vsyncpa [#allocation3 + $0x1], 0 }
  0x12   :  { %27 = vsyncpa [#allocation6], 0 }
  0x13   :  { %28 = vsyncpa [#allocation9], 0 }
  0x14   :  { %29 = vsyncpa [#allocation12], 0 }
  0x15   :  { %30 = vsyncpa [#allocation15], 0 }
  0x16   :  { %31 = vsyncpa [#allocation18], 0 }
  0x17   :  { %32 = vsyncpa [#allocation4], 0 }
  0x18   :  { %34 = vsyncpa [#allocation4 + $0x1], 0  ;;  %s2203_s0 = smov 0   ;;  %s2205_s30 = smov 0  }
  0x19   :  { %s2207_s20 = smov 0   ;;  %s2209_s21 = smov 0  }
  0x1a LB: > { %s2533_s4 = sld [smem:[#allocation31_spill]]  ;;  %s2227_s23 = sadd.s32 4294967295, %s2086_s21   ;;  %s2086_s21 = sphi %s2209_s21, %s2559_s21   ;;  %s2082_s20 = sphi %s2207_s20, %s2558_s20   ;;  %s2078_s30 = sphi %s2205_s30, %s2557_s30   ;;  %s2074_s0 = sphi %s2203_s0, %s2556_s0  }
  0x1b   : > { %p1423_p0 = scmp.ge.s32.totalorder %s2086_s21, 1  ;;  %p87_p1 = scmp.eq.s32.totalorder %s2227_s23, 0 }
  0x1c   : > { %p485_p2 = scmp.lt.s32.totalorder %s2086_s21, 3  ;;  %s2088_s25 = smov [#allocation5]  }
  0x1d   : > { %s502_s3 = sshll.u32 %s2088_s25, 4  ;;  %s2535_s8 = sld [smem:[#allocation33_spill]]  ;;  %s503_s3 = int_to_ptr.vmem [resolvable:$true] %s502_s3 }
  0x1e   : > { %p2232_p3 = pnand %p1423_p0, %p485_p2  ;;  %s2089_s1 = smov [#allocation8]  }
  0x1f   : > { %s532_s22 = sshll.u32 %s2089_s1, 4  ;;  %s2537_s10 = sld [smem:[#allocation35_spill]]  ;;  %s533_s22 = int_to_ptr.vmem [resolvable:$true] %s532_s22 }
  0x20   : > { %s500_s2 = sshll.u32 %s2533_s4, 4  ;;  %p1571_p5 = pneg %p2232_p3  ;;  %s501_s2 = int_to_ptr.hbm [resolvable:$true] %s500_s2 }
  0x21   : > { %s2538_s12 = sld [smem:[#allocation37_spill]]  ;;  %s2090_s18 = smov [#allocation11]  }
  0x22   : > { %p2244_p6 = pnand %p1571_p5, %p87_p1  ;;  %s558_s17 = sshll.u32 %s2090_s18, 4  ;;  %s559_s17 = int_to_ptr.vmem [resolvable:$true] %s558_s17 }
  0x23   : > { %s530_s28 = sshll.u32 %s2535_s8, 4  ;;  %s2091_s1 = smov [#allocation14]   ;;  %s531_s28 = int_to_ptr.hbm [resolvable:$true] %s530_s28 }
  0x24   : > { %1574 = dma.hbm_to_vmem [thread:$0]  (!%p2244_p6), %s501_s2, 16, %s503_s3, [#allocation6]  }
  0x25   : > { %s556_s19 = sshll.u32 %s2537_s10, 4  ;;  %s582_s4 = sshll.u32 %s2091_s1, 4  ;;  %s557_s19 = int_to_ptr.hbm [resolvable:$true] %s556_s19  ;;  %s583_s4 = int_to_ptr.vmem [resolvable:$true] %s582_s4 }
  0x26   : > { %1580 = dma.hbm_to_vmem [thread:$0]  (!%p2244_p6), %s531_s28, 16, %s533_s22, [#allocation9]  }
  0x27   : > { %s580_s8 = sshll.u32 %s2538_s12, 4  ;;  %s2539_s6 = sld [smem:[#allocation32_spill]]  ;;  %s581_s8 = int_to_ptr.hbm [resolvable:$true] %s580_s8 }
  0x28   : > { %1586 = dma.hbm_to_vmem [thread:$0]  (!%p2244_p6), %s557_s19, 16, %s559_s17, [#allocation12]  }
  0x29   : > { %1592 = dma.hbm_to_vmem [thread:$0]  (!%p2244_p6), %s581_s8, 16, %s583_s4, [#allocation15]  }
  0x2a   : > { %s2540_s9 = sld [smem:[#allocation34_spill]]  ;;  %s2092_s18 = smov [#allocation7]  }
  0x2b   : > { %s517_s26 = sshll.u32 %s2092_s18, 4  ;;  %s2093_s17 = smov [#allocation10]   ;;  %s518_s26 = int_to_ptr.vmem [resolvable:$true] %s517_s26 }
  0x2c   : > { %s543_s19 = sshll.u32 %s2093_s17, 4  ;;  %s2094_s10 = smov 64   ;;  %s544_s19 = int_to_ptr.vmem [resolvable:$true] %s543_s19 }
  0x2d   : > { %s515_s2 = sshll.u32 %s2539_s6, 4  ;;  %s2095_s27 = smov 4   ;;  %s516_s2 = int_to_ptr.hbm [resolvable:$true] %s515_s2 }
  0x2e   : > { %1577 = dma.hbm_to_vmem [thread:$0]  (!%p2244_p6), %s516_s2, 16, %s518_s26, [#allocation6]  }
  0x2f   : > { %s2541_s11 = sld [smem:[#allocation36_spill]]  ;;  %s2096_s25 = smov [#allocation13]  }
  0x30   : > { %s541_s22 = sshll.u32 %s2540_s9, 4  ;;  %s570_s3 = sshll.u32 %s2096_s25, 4  ;;  %s542_s22 = int_to_ptr.hbm [resolvable:$true] %s541_s22  ;;  %s571_s3 = int_to_ptr.vmem [resolvable:$true] %s570_s3 }
  0x31   : > { %1583 = dma.hbm_to_vmem [thread:$0]  (!%p2244_p6), %s542_s22, 256, %s544_s19, [#allocation9], %s2094_s10, %s2094_s10, %s2095_s27  }
  0x32   : > { %s2542_s13 = sld [smem:[#allocation38_spill]]  ;;  %s2097_s22 = smov [#allocation16]  }
  0x33   : > { %s593_s26 = sshll.u32 %s2097_s22, 4  ;;  %s606_s8 = sshll.u32 %s2509_s14, 4  ;;  %s594_s26 = int_to_ptr.vmem [resolvable:$true] %s593_s26  ;;  %s607_s8 = int_to_ptr.hbm [resolvable:$true] %s606_s8 }
  0x34   : > { %s2098_s1 = smov [#allocation17]   ;;  %s1422_s25 = sadd.s32 4294967294, %s2086_s21  }
  0x35   : > { %s568_s4 = sshll.u32 %s2541_s11, 4  ;;  %s73_s2 = sadd.s32 1, %s2082_s20  ;;  %s569_s4 = int_to_ptr.hbm [resolvable:$true] %s568_s4 }
  0x36   : > { %1589 = dma.hbm_to_vmem [thread:$0]  (!%p2244_p6), %s569_s4, 16, %s571_s3, [#allocation12]  }
  0x37   : > { %s608_s4 = sshll.u32 %s2098_s1, 4  ;;  %s2289_s3 = sadd.s32 1, %s2086_s21   ;;  %s609_s4 = int_to_ptr.vmem [resolvable:$true] %s608_s4 }
  0x38   : > { %s591_s18 = sshll.u32 %s2542_s13, 4  ;;  %s70_s28 = ssub.s32 %s2086_s21, %s2289_s3  ;;  %s592_s18 = int_to_ptr.hbm [resolvable:$true] %s591_s18 }
  0x39   : > { %1595 = dma.hbm_to_vmem [thread:$0]  (!%p2244_p6), %s592_s18, 256, %s594_s26, [#allocation15], %s2094_s10, %s2094_s10, %s2095_s27  }
  0x3a   : > { %1598 = dma.hbm_to_vmem [thread:$0]  (!%p2244_p6), %s607_s8, 16, %s609_s4, [#allocation18]  }
  0x3b   : > { %p80_p7 = scmp.ne.s32.totalorder %s2082_s20, %s2078_s30  ;;  %p71_p8 = scmp.eq.s32.totalorder %s70_s28, 0 }
  0x3c   : > { %p81_p9 = scmp.eq.s32.totalorder %s2086_s21, 0  ;;  %p86_p10 = scmp.ne.s32.totalorder %s2078_s30, %s2074_s0 }
  0x3d   : > { %p472_p11 = scmp.eq.s32.totalorder %s2227_s23, 1  ;;  %p478_p0 = scmp.eq.s32.totalorder %s1422_s25, 1 }
  0x3e   : > { %s2301_s10 = scalar_select %p71_p8, %s2082_s20, %s73_s2  }
  0x3f   : > { %p2305_p12 = por %p87_p1, %p86_p10  ;;  %p2309_p13 = por %p472_p11, %p80_p7 }
  0x40   : > { %p82_p2 = por %p81_p9, %p80_p7  ;;  %s638_s18 = sand.u32 1, %s2082_s20  }
  0x41   : > { %p2314_p5 = por %p478_p0, %p86_p10  ;;  %p1616_p6 = scmp.lt.s32.totalorder %s2086_s21, 2 }
  0x42   : > { %s2546_s19 = sld [smem:[#allocation28_spill]]  ;;  %s641_s4 = scalar_lea.vmem [#allocation2], %s638_s18 }
  0x43   : > { %s648_s2 = sshll.u32 %s641_s4, 4  ;;  %p2323_p8 = pnand %p1616_p6, %p82_p2  ;;  %s649_s2 = int_to_ptr.vmem [resolvable:$true] %s648_s2 }
  0x44   : > { %s639_s25 = scalar_lea.sflag [#allocation3], %s638_s18 }
  0x45   : > { %p1974_p9 = pneg %p2323_p8 }
  0x48   : > { %s644_s8 = scalar_lea.hbm %s2546_s19, %s2086_s21 }
  0x49   : > { %s646_s1 = sshll.u32 %s644_s8, 4  ;;  %s1977_s8 = scalar_lea.hbm %s2546_s19, 2  ;;  %s647_s1 = int_to_ptr.hbm [resolvable:$true] %s646_s1 }
  0x4a   : > { %s1970_s6 = sshra.s32 %s647_s1, 4  ;;  %s1971_s6 = int_to_ptr.hbm [resolvable:$true] %s1970_s6 }
  0x4b   : > { %s1972_s9 = scalar_lea.hbm %s1971_s6, 1  ;;  %p1978_p0 = scmp.lt.s32.totalorder %s1971_s6, %s2546_s19 }
  0x4c   : > { %p1973_p7 = scmp.ne.s32.totalorder %s1971_s6, %s1972_s9  ;;  %p1979_p2 = scmp.lt.s32.totalorder %s1977_s8, %s1972_s9 }
  0x4e   : > { %p1975_p10 = pnand %p1974_p9, %p1973_p7  ;;  %p1980_p6 = por %p1979_p2, %p1978_p0 }
  0x50   : > { %p1976_p11 = pneg %p1975_p10 }
  0x52   : > { %p1981_p4 = pnand %p1980_p6, %p1976_p11 }
  0x54   : > { %1984 = shalt.err (!%p1981_p4)
}
  0x55   : > { %1602 = dma.hbm_to_vmem [thread:$0]  (!%p2323_p8), %s647_s1, 16, %s649_s2, %s639_s25  }
  0x56   : > { %664 = sbr.rel (%p2232_p3) target bundleno = 1946 (0x79a), region = 96  ;;  %s2340_s18 = sand.u32 (!%p2232_p3), 1, %s2078_s30  }
  0x57   : > { %s667_s26 = scalar_lea.sflag (!%p2232_p3), [#allocation3], %s2340_s18 }
  0x5b   : > { %2045 = dma.done.wait (%p2305_p12), %s667_s26, 16  }
  0x5c   : > { %2047 = vsyncadd (%p2305_p12), %s667_s26, 4294967280 }
  0x5d   : > { %2049 = dma.done.wait (%p87_p1), [#allocation6], 32  }
  0x5e   : > { %2051 = vsyncadd (%p87_p1), [#allocation6], 4294967264 }
  0x5f   : > { %2053 = dma.done.wait (%p87_p1), [#allocation9], 272  }
  0x60   : > { %2055 = vsyncadd (%p87_p1), [#allocation9], 4294967024 }
  0x61   : > { %2057 = dma.done.wait (%p87_p1), [#allocation12], 32  }
  0x62   : > { %2059 = vsyncadd (%p87_p1), [#allocation12], 4294967264 }
  0x63   : > { %2061 = dma.done.wait (%p87_p1), [#allocation15], 272  }
  0x64   : > { %2063 = vsyncadd (%p87_p1), [#allocation15], 4294967024 }
  0x65   : > { %2065 = dma.done.wait (%p87_p1), [#allocation18], 16  }
  0x66   : > { %2067 = vsyncadd (%p87_p1), [#allocation18], 4294967280  ;;  %p777_p3 = scmp.lt.s32.totalorder %s2227_s23, 1  ;;  %s2548_s29 = sld [smem:[#allocation27_spill]]  ;;  %v1520_v1 = vld [vmem:[%s2500_s5 + $0x8] sm:$0xff]  ;;  %v1519_v3 = vld [vmem:[%s2500_s5] sm:$0xff] }
  0x67   : > { %s2549_s25 = sld [smem:[#allocation30_spill]]  ;;  %854 = vmatpush.bf16.msra.mxu1 %v1520_v1  ;;  %vm810_vm0 = vcmask 261120   ;;  %v1676_v6 = vld [vmem:[#allocation7] ss:$0 sm:$0xff]  ;;  %v1675_v9 = vld [vmem:[#allocation5] ss:$0 sm:$0xff] }
  0x68   : > { %s2370_s6 = scalar_select %p777_p3, %s2227_s23, 1  ;;  %vm905_vm1 = vcmask 130048   ;;  %v1522_v22 = vld [vmem:[%s2502_s7 + $0x8] sm:$0xff]  ;;  %v1521_v23 = vld [vmem:[%s2502_s7] sm:$0xff]  ;;  %vm951_vm2 = vcmask 64512   ;;  %vm979_vm3 = vcmask 1043456  }
  0x69   : > { %s2099_s12 = smov 112   ;;  %888 = vmatpush.bf16.msra.mxu2 %v1522_v22  ;;  %v1678_v33 = vld [vmem:[#allocation8] ss:$0 sm:$0xff]  ;;  %v1524_v59 = vld [vmem:[#allocation10 + $0x8] sm:$0xff]  ;;  %s2551_s8 = sld [smem:[#allocation29_spill]]  ;;  %vm1178_vm8 = vcmask 523264  }
  0x6a   : > { %s1445_s9 = sshll.u32 %s2370_s6, 3  ;;  %s1444_s2 = sshll.u32 %s2340_s18, 3 }
  0x6b   : > { %855 = vmatpush.bf16.msra.mxu1 %v1519_v3  ;;  %s1514_s28 = sshll.u32 %s2227_s23, 3  ;;  %s2552_s6 = sld [smem:[#allocation39_spill]] }
  0x6c   : > { %s780_s1 = scalar_lea.vmem %s2548_s29, %s1445_s9  ;;  %s2550_s29 = scalar_lea.vmem [#allocation2], %s2340_s18 }
  0x6d   : > { %v1518_v0 = vld [vmem:[%s2549_s25 + $0x8] sm:$0xff]  ;;  %v1517_v2 = vld [vmem:[%s2549_s25] sm:$0xff]  ;;  %889 = vmatpush.bf16.msra.mxu2 %v1521_v23  ;;  %s2554_s11 = sld [smem:[#allocation41_spill]] }
  0x6e   : > { %820 = vmatpush.bf16.msra.mxu0 %v1518_v0  ;;  %v2390_v4 = vld [vmem:[%s780_s1] sm:$0xff]  ;;  %s2100_s1 = smov 16   ;;  %v1523_v0 = vld [vmem:[#allocation10] sm:$0xff] }
  0x6f   : > { %v789_v5 = vpack.c.bf16 %v2390_v4, %v2390_v4  ;;  %v1677_v26 = vld [vmem:[%s2550_s29] ss:$0 sm:$0xff]  ;;  %s784_s4 = scalar_lea.vmem %s2551_s8, %s1445_s9  ;;  %s776_s29 = scalar_lea.vmem [#allocation19], %s1444_s2 }
  0x70   : > { %s1243_s23 = sshll.u32 %s776_s29, 4  ;;  %s1231_s8 = scalar_lea.sflag [#allocation4], %s2340_s18  ;;  %s1244_s23 = int_to_ptr.vmem [resolvable:$true] %s1243_s23 }
  0x71   : > { %1464 = vmatmul.msk.bf16.vlgmr.msra.gmra.mxu1 %vm810_vm0, %v789_v5  ;;  %1473 = vmatmul.msk.bf16.vlgmr.msra.gmra.mxu2 %vm810_vm0, %v789_v5 }
  0x72   : > { %821 = vmatpush.bf16.msra.mxu0 %v1517_v2 }
  0x73   : > { %s1241_s24 = scalar_lea.hbm %s2554_s11, %s1514_s28  ;;  %s2020_s2 = scalar_lea.hbm %s2554_s11, 16 }
  0x75   : > { %1455 = vmatmul.msk.bf16.vlgmr.msra.gmra.mxu0 %vm810_vm0, %v789_v5  ;;  %v1679_v5 = vld [vmem:[#allocation11] ss:$0 sm:$0xff] }
  0xee   : > { %v857_v8 = vpop.f32.mrf.mxu1 }
  0xef   : > { %v858_v10 = vadd.f32 %v1676_v6, %v857_v8 }
  0xf1   : > { %v861_v11 = vpack.c.bf16 %v858_v10, %v858_v10 }
  0xf2   : > { %v823_v7 = vpop.f32.mrf.mxu0 }
  0xf3   : > { %v824_v12 = vadd.f32 %v1675_v9, %v823_v7  ;;  %900 = vrot.lane.b32.xlu0 %v861_v11, %s2099_s12  ;;  %v910_v13 = vsel %vm905_vm1, %v861_v11, 0  ;;  %v2101_v11 = vmov 32.0  }
  0xf4   : > { %919 = vmatpush.bf16.xpose.msra.mxu3 %v910_v13  ;;  %v891_v36 = vpop.f32.mrf.mxu2  ;;  %v2102_v13 = vmov 0  }
  0xf5   : > { %v827_v16 = vpack.c.bf16 %v824_v12, %v824_v12  ;;  %v892_v37 = vadd.f32 %v1678_v33, %v891_v36  ;;  %v788_v12 = vld [vmem:[%s784_s4] sm:$0xff]  ;;  %1674 = vset.pattern.permute.xlu0 %v2102_v13 }
  0xf6   : > { %v859_v15 = vpop.f32.mrf.mxu1 }
  0xf7   : > { %v895_v39 = vpack.c.bf16 %v892_v37, %v892_v37  ;;  %v1680_v37 = vld [vmem:[#allocation13] ss:$0 sm:$0xff] }
  0xf9   : > { %v981_v40 = vsel %vm979_vm3, %v895_v39, 0 }
  0xfa   : > { %v825_v14 = vpop.f32.mrf.mxu0  ;;  %990 = vmatpush.bf16.msrb.mxu1 %v981_v40 }
  0xfb   : > { %897 = vrot.lane.b32.xlu0 %v827_v16, %s2099_s12  ;;  %1474 = vmatmul.msk.bf16.vlgmr.msra.gmra.mxu3 %vm905_vm1, %v827_v16 }
  0xfc   : > { %v893_v43 = vpop.f32.mrf.mxu2  ;;  %1050 = vmatpush.bf16.msrb.mxu3 %v1524_v59 }
 0x100   : > { %1051 = vmatpush.bf16.msrb.mxu3 %v1523_v0 }
 0x165   : > { %v901_v17 = vpop.permute.xlu0 %900 }
 0x166   : > { %v929_v18 = vsel %vm905_vm1, %v901_v17, 0 }
 0x167   : > { %938 = vmatpush.bf16.xpose.msrb.mxu0 %v929_v18 }
 0x16d   : > { %v898_v19 = vpop.permute.xlu0 %897 }
 0x16e   : > { %1475 = vmatmul.msk.bf16.vlgmr.msrb.gmra.mxu0 %vm905_vm1, %v898_v19 }
 0x17e   : > { %v921_v20 = vpop.f32.mrf.mxu3 }
 0x17f   : > { %v944_v28 = vmul.f32 0.25, %v921_v20 }
 0x181   : > { %v949_v31 = vadd.f32 %v1677_v26, %v944_v28  ;;  %v1530_v28 = vld [vmem:[%s2510_s15 + $0x18] sm:$0xff] }
 0x182   : > { %1186 = vmatpush.bf16.msra.mxu1 %v1530_v28 }
 0x183   : > { %v952_v32 = vsel %vm951_vm2, %v949_v31, -inf }
 0x186   : > { %v923_v21 = vpop.f32.mrf.mxu3 }
 0x1eb   : > { %v940_v24 = vpop.f32.mrf.mxu0 }
 0x1ec   : > { %v945_v25 = vmul.f32 0.25, %v940_v24  ;;  %v1526_v24 = vld [vmem:[#allocation16 + $0x8] sm:$0xff] }
 0x1ed   : > { %1133 = vmatpush.bf16.msra.mxu0 %v1526_v24 }
 0x1ee   : > { %v950_v27 = vadd.f32 %v1677_v26, %v945_v25  ;;  %v1525_v25 = vld [vmem:[#allocation16] sm:$0xff] }
 0x1f0   : > { %v955_v29 = vsel %vm951_vm2, %v950_v27, -inf }
 0x1f1   : > { %956 = vmax.xlane.f32.xlu1 %v955_v29  ;;  %1134 = vmatpush.bf16.msra.mxu0 %v1525_v25 }
 0x1f3   : > { %v942_v30 = vpop.f32.mrf.mxu0 }
 0x1f4   : > { %v1529_v30 = vld [vmem:[%s2510_s15 + $0x10] sm:$0xff] }
 0x1f5   : > { %1187 = vmatpush.bf16.msra.mxu1 %v1529_v30 }
 0x1f9   : > { %953 = vmax.xlane.f32.xlu1 %v952_v32 }
 0x264   : > { %v957_v34 = vpop.xlane.xlu1 %956 }
 0x265   : > { %v959_v35 = vsub.f32 %v950_v27, %v957_v34 }
 0x267   : > { %v962_v38 = vmul.f32 1.442695, %v959_v35 }
 0x269   : > { %1686 = vpow2.f32 %v962_v38 }
 0x26c   : > { %v954_v41 = vpop.xlane.xlu1 %953 }
 0x26d   : > { %v958_v42 = vsub.f32 %v949_v31, %v954_v41 }
 0x26f   : > { %v1687_v44 = vpop.eup %1686  ;;  %v960_v45 = vmul.f32 1.442695, %v958_v42 }
 0x270   : > { %v967_v46 = vsel %vm951_vm2, %v1687_v44, 0.0 }
 0x271   : > { %1688 = vpow2.f32 %v960_v45  ;;  %968 = vadd.xlane.f32.xlu2 %v967_v46  ;;  %v1528_v46 = vld [vmem:[%s2510_s15 + $0x8] sm:$0xff] }
 0x272   : > { %1188 = vmatpush.bf16.msra.mxu1 %v1528_v46 }
 0x277   : > { %v1689_v47 = vpop.eup %1688 }
 0x278   : > { %v964_v48 = vsel %vm951_vm2, %v1689_v47, 0.0 }
 0x279   : > { %965 = vadd.xlane.f32.xlu0 %v964_v48  ;;  %v1682_v48 = vld [vmem:[#allocation17] ss:$0 sm:$0xff] }
 0x289   : > { %903 = vrot.lane.b32.xlu2 %v895_v39, %s2099_s12  ;;  %v1681_v39 = vld [vmem:[#allocation14] ss:$0 sm:$0xff]  ;;  %s2553_s12 = sld [smem:[#allocation40_spill]] }
 0x28d   : > { %1099 = vperm.xlu0 %1674, %v788_v12  }
 0x28f   : > { %v1685_v13 = vld [vmem:[%s2553_s12] ss:$0 sm:$0xff] }
 0x2e4   : > { %v969_v49 = vpop.xlane.xlu2 %968 }
 0x2e5   : > { %1690 = vrcp.f32 %v969_v49 }
 0x2eb   : > { %v1691_v50 = vpop.eup %1690 }
 0x2ec   : > { %v973_v51 = vmul.f32 %v1691_v50, %v1687_v44  ;;  %v904_v52 = vpop.permute.xlu2 %903  ;;  %v966_v53 = vpop.xlane.xlu0 %965 }
 0x2ed   : > { %1692 = vrcp.f32 %v966_v53  ;;  %v1000_v54 = vsel %vm979_vm3, %v904_v52, 0 }
 0x2ee   : > { %1009 = vmatpush.bf16.msrb.mxu2 %v1000_v54  ;;  %v975_v55 = vpack.c.bf16 %v973_v51, %v973_v51  ;;  %1694 = vrcp.f32 %v2101_v11  ;;  %v1683_v54 = vld [vmem:[%s2511_s16] ss:$0 sm:$0xff] }
 0x2ef   : > { %v1684_v11 = vld [vmem:[%s2552_s6] ss:$0 sm:$0xff] }
 0x2f1   : > { %1477 = vmatmul.msk.bf16.vlgmr.msrb.gmra.mxu2 %vm951_vm2, %v975_v55 }
 0x2f3   : > { %v1693_v56 = vpop.eup %1692 }
 0x2f4   : > { %v972_v57 = vmul.f32 %v1693_v56, %v1689_v47  ;;  %v1695_v14 = vpop.eup %1694  ;;  %v1527_v47 = vld [vmem:[%s2510_s15] sm:$0xff] }
 0x2f5   : > { %v1064_v15 = vmul.f32 32.0, %v1695_v14  ;;  %vm1068_vm4 = vweird.f32 %v1695_v14  ;;  %1189 = vmatpush.bf16.msra.mxu1 %v1527_v47 }
 0x2f6   : > { %v974_v58 = vpack.c.bf16 %v972_v57, %v972_v57 }
 0x2f7   : > { %v1065_v16 = vsub.f32 1.0, %v1064_v15 }
 0x2f8   : > { %1476 = vmatmul.msk.bf16.vlgmr.msrb.gmra.mxu1 %vm951_vm2, %v974_v58 }
 0x2f9   : > { %v1066_v17 = vmul.f32 %v1695_v14, %v1065_v16 }
 0x2ff   : > { %v1100_v42 = vpop.permute.xlu0 %1099 }
 0x374   : > { %v1011_v60 = vpop.f32.mrf.mxu2 }
 0x375   : > { %1016 = vrot.lane.b32.xlu1 %v1011_v60, %s2100_s1  ;;  %v992_v61 = vpop.f32.mrf.mxu1  ;;  %s1245_s1 = sshll.u32 %s1241_s24, 4  ;;  %s1246_s1 = int_to_ptr.hbm [resolvable:$true] %s1245_s1 }
 0x376   : > { %s2014_s4 = sshra.s32 %s1246_s1, 4  ;;  %s2015_s4 = int_to_ptr.hbm [resolvable:$true] %s2014_s4 }
 0x377   : > { %s2016_s6 = scalar_lea.hbm %s2015_s4, 8  ;;  %p2021_p8 = scmp.lt.s32.totalorder %s2015_s4, %s2554_s11 }
 0x378   : > { %p2017_p1 = scmp.ne.s32.totalorder %s2015_s4, %s2016_s6  ;;  %p2022_p7 = scmp.lt.s32.totalorder %s2020_s2, %s2016_s6 }
 0x37a   : > { %p2018_p4 = pnand %p2017_p1, %p2309_p13  ;;  %p2023_p9 = por %p2022_p7, %p2021_p8 }
 0x37c   : > { %v1013_v62 = vpop.f32.mrf.mxu2  ;;  %p2019_p12 = pneg %p2018_p4 }
 0x37d   : > { %v994_v63 = vpop.f32.mrf.mxu1 }
 0x37e   : > { %p2024_p10 = pnand %p2023_p9, %p2019_p12 }
 0x3e7   : > { %v1017_v1 = vpop.permute.xlu1 %1016 }
 0x3e8   : > { %v1019_v2 = vsel %vm905_vm1, %v992_v61, %v1017_v1 }
 0x3e9   : > { %v1020_v3 = vpack.c.bf16 %v1019_v2, %v1019_v2 }
 0x3eb   : > { %1486 = vmatmul.msk.bf16.vlgmr.msrb.gmra.mxu3 %vm810_vm0, %v1020_v3 }
 0x46e   : > { %v1053_v6 = vpop.f32.mrf.mxu3 }
 0x46f   : > { %v1054_v7 = vadd.f32 %v1679_v5, %v1053_v6 }
 0x471   : > { %v1057_v8 = vadd.f32 %v1054_v7, %v2390_v4  ;;  %v1067_v4 = vadd.f32 %v1695_v14, %v1066_v17 }
 0x473   : > { %v1060_v9 = vsel %vm810_vm0, %v1057_v8, 0.0  ;;  %v2429_v18 = vsel %vm1068_vm4, %v1695_v14, %v1067_v4 }
 0x474   : > { %1061 = vadd.xlane.f32.xlu2 %v1060_v9 }
 0x476   : > { %v1055_v10 = vpop.f32.mrf.mxu3 }
 0x4e7   : > { %v1062_v19 = vpop.xlane.xlu2 %1061 }
 0x4e8   : > { %v1070_v20 = vmul.f32 %v2429_v18, %v1062_v19 }
 0x4ea   : > { %v1071_v21 = vsub.f32 %v1057_v8, %v1070_v20 }
 0x4ec   : > { %v1072_v22 = vmul.f32 %v1071_v21, %v1071_v21 }
 0x4ee   : > { %v1073_v23 = vsel %vm810_vm0, %v1072_v22, 0.0 }
 0x4ef   : > { %1074 = vadd.xlane.f32.xlu1 %v1073_v23 }
 0x562   : > { %v1075_v26 = vpop.xlane.xlu1 %1074 }
 0x563   : > { %v1076_v27 = vmul.f32 %v1075_v26, %v2429_v18 }
 0x565   : > { %v1077_v29 = vadd.f32 1e-05, %v1076_v27 }
 0x567   : > { %1696 = vrsqrt.f32 %v1077_v29  ;;  %vm1084_vm6 = vweird.f32 %v1077_v29 }
 0x56d   : > { %v1697_v31 = vpop.eup %1696 }
 0x56e   : > { %v1079_v32 = vmul.f32 %v1697_v31, %v1077_v29  ;;  %vm1085_vm5 = vweird.f32 %v1697_v31 }
 0x56f   : > { %vm1086_vm7 = vmor %vm1084_vm6, %vm1085_vm5 }
 0x570   : > { %v1080_v33 = vmul.f32 %v1697_v31, %v1079_v32 }
 0x572   : > { %v1081_v34 = vmul.f32 0.5, %v1080_v33 }
 0x574   : > { %v1082_v35 = vsub.f32 1.5, %v1081_v34 }
 0x576   : > { %v1083_v36 = vmul.f32 %v1697_v31, %v1082_v35 }
 0x578   : > { %v1087_v38 = vsel %vm1086_vm7, %v1697_v31, %v1083_v36 }
 0x579   : > { %v1088_v40 = vmul.f32 %v1087_v38, %v1071_v21 }
 0x57b   : > { %v1092_v41 = vmul.f32 %v1680_v37, %v1088_v40 }
 0x57d   : > { %v1096_v43 = vadd.f32 %v1681_v39, %v1092_v41 }
 0x57f   : > { %v1102_v44 = vmul.f32 %v1100_v42, %v1096_v43 }
 0x581   : > { %v1103_v45 = vpack.c.bf16 %v1102_v44, %v1102_v44 }
 0x583   : > { %1495 = vmatmul.msk.bf16.vlgmr.msra.gmra.mxu0 %vm810_vm0, %v1103_v45 }
 0x600   : > { %v1136_v49 = vpop.f32.mrf.mxu0 }
 0x601   : > { %v1137_v50 = vadd.f32 %v1682_v48, %v1136_v49 }
 0x603   : > { %v1140_v51 = vmax.f32 %v1137_v50, 0.0 }
 0x605   : > { %v1141_v52 = vpack.c.bf16 %v1140_v51, %v1140_v51 }
 0x607   : > { %1512 = vmatmul.msk.bf16.vlgmr.msra.gmra.mxu1 %vm1178_vm8, %v1141_v52 }
 0x608   : > { %v1138_v53 = vpop.f32.mrf.mxu0 }
 0x684   : > { %v1191_v55 = vpop.f32.mrf.mxu1 }
 0x685   : > { %v1192_v56 = vadd.f32 %v1683_v54, %v1191_v55 }
 0x687   : > { %v1195_v57 = vadd.f32 %v1192_v56, %v1102_v44 }
 0x689   : > { %v1198_v58 = vsel %vm810_vm0, %v1195_v57, 0.0 }
 0x68a   : > { %1199 = vadd.xlane.f32.xlu2 %v1198_v58 }
 0x68c   : > { %v1193_v59 = vpop.f32.mrf.mxu1 }
 0x6fd   : > { %v1200_v60 = vpop.xlane.xlu2 %1199 }
 0x6fe   : > { %v1201_v61 = vmul.f32 %v1200_v60, %v2429_v18 }
 0x700   : > { %v1202_v62 = vsub.f32 %v1195_v57, %v1201_v61 }
 0x702   : > { %v1203_v63 = vmul.f32 %v1202_v62, %v1202_v62 }
 0x704   : > { %v1204_v0 = vsel %vm810_vm0, %v1203_v63, 0.0 }
 0x705   : > { %1205 = vadd.xlane.f32.xlu2 %v1204_v0 }
 0x778   : > { %v1206_v1 = vpop.xlane.xlu2 %1205 }
 0x779   : > { %v1207_v2 = vmul.f32 %v1206_v1, %v2429_v18 }
 0x77b   : > { %v1208_v3 = vadd.f32 1e-05, %v1207_v2 }
 0x77d   : > { %1698 = vrsqrt.f32 %v1208_v3  ;;  %vm1215_vm10 = vweird.f32 %v1208_v3 }
 0x783   : > { %v1699_v5 = vpop.eup %1698 }
 0x784   : > { %v1210_v6 = vmul.f32 %v1699_v5, %v1208_v3  ;;  %vm1216_vm9 = vweird.f32 %v1699_v5 }
 0x785   : > { %vm1217_vm11 = vmor %vm1215_vm10, %vm1216_vm9 }
 0x786   : > { %v1211_v7 = vmul.f32 %v1699_v5, %v1210_v6 }
 0x788   : > { %v1212_v8 = vmul.f32 0.5, %v1211_v7 }
 0x78a   : > { %v1213_v9 = vsub.f32 1.5, %v1212_v8 }
 0x78c   : > { %v1214_v10 = vmul.f32 %v1699_v5, %v1213_v9 }
 0x78e   : > { %v1218_v12 = vsel %vm1217_vm11, %v1699_v5, %v1214_v10 }
 0x78f   : > { %v1219_v14 = vmul.f32 %v1218_v12, %v1202_v62 }
 0x791   : > { %v1223_v15 = vmul.f32 %v1684_v11, %v1219_v14 }
 0x793   : > { %v1227_v16 = vadd.f32 %v1685_v13, %v1223_v15 }
 0x795   : > { %v1228_v17 = vmul.f32 %v1227_v16, %v1100_v42 }
 0x797   : > { %1229 = vst.msk [vmem:[%s776_s29] sm:$0xff] %vm810_vm0, %v1228_v17 }
 0x798   : > { %2027 = shalt.err (!%p2024_p10)
}
 0x799   : > { %1569 = dma.vmem_to_hbm [thread:$0]  (%p2309_p13), %s1244_s23, 128, %s1246_s1, %s1231_s8  }
 0x79a PF: > { %s1257_s18 = sand.u32 1, %s2074_s0   ;;  %p2555_p11 = scmp.ge.s32.totalorder %s2086_s21, 2 }
 0x79b   : > { %s1258_s13 = scalar_lea.sflag [#allocation4], %s1257_s18 }
 0x79c   : > { %p1604_p0 = pnand %p2555_p11, %p2314_p5 }
 0x79e   : > { %p1605_p2 = pneg %p1604_p0 }
 0x7a0   : > { %2069 = dma.done.wait (%p1605_p2), %s1258_s13, 128  }
 0x7a1   : > { %2071 = vsyncadd (%p1605_p2), %s1258_s13, 4294967168  ;;  %p37_p6 = scmp.ge.s32.totalorder %s2289_s3, 4   ;;  %s2556_s0 = smov %s2078_s30 }
 0x7a2   : > { %s2557_s30 = smov %s2082_s20  ;;  %s2558_s20 = smov %s2301_s10 }
 0x7a3   : > { %s2559_s21 = smov %s2289_s3  ;;  %39 = sbr.rel (!%p37_p6) target bundleno = 26 (0x1a), region = 183 }
 0x7a8   :  { %1264 = vsyncpa [#allocation3], 1 }
 0x7a9   :  { %1266 = vsyncpa [#allocation3 + $0x1], 1 }
 0x7aa   :  { %1267 = vsyncpa [#allocation6], 1 }
 0x7ab   :  { %1268 = vsyncpa [#allocation9], 1 }
 0x7ac   :  { %1269 = vsyncpa [#allocation12], 1 }
 0x7ad   :  { %1270 = vsyncpa [#allocation15], 1 }
 0x7ae   :  { %1271 = vsyncpa [#allocation18], 1 }
 0x7af   :  { %1272 = vsyncpa [#allocation4], 1 }
 0x7b0   :  { %1274 = vsyncpa [#allocation4 + $0x1], 1 }

</bundles_post_ra>
